<compile_context>
chip_gen: v7x
topology: tpu7x:2x2x1
jax: 0.10.0
libtpu: 0.0.40
codegen_flags: <defaults>
</compile_context>

<pallas_src>
import functools
import math

import jax
import jax.numpy as jnp
from jax.experimental import pallas as pl
from jax.experimental.pallas import tpu as pltpu


_NEG_BIG = -1e30          # additive mask bias standing in for -inf
_ROW_DEAD_THRESH = -1e29  # rows whose max bias is below this are fully masked


def _round_up(x, m):
    return ((x + m - 1) // m) * m


def _agent_kernel(ents_ref, bias_ref, keep_ref,
                  w1t_ref, b1_ref, wint_ref, woutt_ref, bout_ref, w2t_ref, b2_ref,
                  q_ref, x2_ref,
                  *, bb, ne, n_heads, head_dim):
    D = n_heads * head_dim
    inv_scale = 1.0 / math.sqrt(float(head_dim))

    # ---- fc1 + relu on the whole (BB*NE, ED) slab: one big MXU matmul ------
    x1 = jnp.maximum(
        jnp.dot(ents_ref[...], w1t_ref[...], preferred_element_type=jnp.float32)
        + b1_ref[...], 0.0)                                          # (BB*NE, D)

    # ---- fused QKV projection (no bias) ------------------------------------
    qkv = jnp.dot(x1, wint_ref[...], preferred_element_type=jnp.float32)  # (BB*NE, 3D)

    # Split into per-batch 3-D views; NE rows per batch element sit in the
    # sublane direction, so these reshapes are layout-trivial.
    q3 = qkv[:, 0:D].reshape(bb, ne, D)
    k3 = qkv[:, D:2 * D].reshape(bb, ne, D)
    v3 = qkv[:, 2 * D:3 * D].reshape(bb, ne, D)

    bias = bias_ref[...]                                             # (BB, NE, NE)
    # Rows where every key is masked must produce exactly 0 (torch NaN -> 0).
    row_ok = jnp.max(bias, axis=-1, keepdims=True) > _ROW_DEAD_THRESH

    head_outs = []
    for h in range(n_heads):                                         # static unroll
        sl = slice(h * head_dim, (h + 1) * head_dim)
        logits = jnp.einsum('bqd,bkd->bqk', q3[:, :, sl], k3[:, :, sl],
                            preferred_element_type=jnp.float32) * inv_scale
        logits = logits + bias                                       # masked -> ~-1e30
        m = jnp.max(logits, axis=-1, keepdims=True)
        p = jnp.exp(logits - m)                                      # masked -> 0
        denom = jnp.sum(p, axis=-1, keepdims=True)                   # >= 1 always
        w = jnp.where(row_ok, p * pl.reciprocal(denom, approx=True), 0.0)
        head_outs.append(jnp.einsum('bqk,bkd->bqd', w, v3[:, :, sl],
                                    preferred_element_type=jnp.float32))
    attn = jnp.concatenate(head_outs, axis=-1).reshape(bb * ne, D)   # (BB*NE, D)

    keep = keep_ref[...]                                             # (BB*NE, 1) 0/1
    out = (jnp.dot(attn, woutt_ref[...], preferred_element_type=jnp.float32)
           + bout_ref[...]) * keep
    x2 = jnp.maximum(out, 0.0)
    qv = (jnp.dot(x2, w2t_ref[...], preferred_element_type=jnp.float32)
          + b2_ref[...]) * keep

    x2_ref[...] = x2                                                 # one store / block
    q_ref[...] = qv


def entity_attention_ff_forward(entities, obs_mask, entity_mask, params,
                                *, n_agents, n_heads, block_b=256):
    bs, ts, ne, ed = entities.shape
    B = bs * ts
    D = params['w1'].shape[0]
    n_actions = params['w2'].shape[0]
    assert D % n_heads == 0
    head_dim = D // n_heads

    # Batch-block size: multiple of 8 so (BB*NE, .) rows satisfy sublane tiling.
    bb = _round_up(min(block_b, _round_up(B, 8)), 8)
    b_pad = _round_up(B, bb)
    num_blocks = b_pad // bb

    ents = entities.reshape(B, ne, ed).astype(jnp.float32)
    # pre-mask as an additive f32 bias (0 keep / -1e30 drop)
    bias = jnp.where(obs_mask.reshape(B, ne, ne).astype(bool),
                     jnp.float32(_NEG_BIG), jnp.float32(0.0))
    # post-mask as a 0/1 float multiplier over every entity row
    keep = 1.0 - entity_mask.reshape(B, ne).astype(jnp.float32)

    if b_pad != B:
        pad = b_pad - B
        ents = jnp.pad(ents, ((0, pad), (0, 0), (0, 0)))
        bias = jnp.pad(bias, ((0, pad), (0, 0), (0, 0)))
        keep = jnp.pad(keep, ((0, pad), (0, 0)))

    ents2d = ents.reshape(b_pad * ne, ed)
    keep2d = keep.reshape(b_pad * ne, 1)

    # pre-transposed weights so every linear is a plain  x @ W_T + b
    w1t = params['w1'].T.astype(jnp.float32)              # (ED, D)
    b1 = params['b1'].reshape(1, D).astype(jnp.float32)
    wint = params['win'].T.astype(jnp.float32)            # (D, 3D)
    woutt = params['wout'].T.astype(jnp.float32)          # (D, D)
    bout = params['bout'].reshape(1, D).astype(jnp.float32)
    w2t = params['w2'].T.astype(jnp.float32)              # (D, n_actions)
    b2 = params['b2'].reshape(1, n_actions).astype(jnp.float32)

    kernel = functools.partial(_agent_kernel, bb=bb, ne=ne,
                               n_heads=n_heads, head_dim=head_dim)

    def const_spec(shape):
        nd = len(shape)
        # constant block index -> Pallas keeps the buffer resident (no re-DMA
        # of the tiny weights across grid steps)
        return pl.BlockSpec(shape, lambda b, _nd=nd: (0,) * _nd)

    q_full, x2_full = pl.pallas_call(
        kernel,
        out_shape=(jax.ShapeDtypeStruct((b_pad * ne, n_actions), jnp.float32),
                   jax.ShapeDtypeStruct((b_pad * ne, D), jnp.float32)),
        grid_spec=pltpu.PrefetchScalarGridSpec(
            num_scalar_prefetch=0,
            grid=(num_blocks,),
            in_specs=[
                pl.BlockSpec((bb * ne, ed), lambda b: (b, 0)),
                pl.BlockSpec((bb, ne, ne), lambda b: (b, 0, 0)),
                pl.BlockSpec((bb * ne, 1), lambda b: (b, 0)),
                const_spec((ed, D)),
                const_spec((1, D)),
                const_spec((D, 3 * D)),
                const_spec((D, D)),
                const_spec((1, D)),
                const_spec((D, n_actions)),
                const_spec((1, n_actions)),
            ],
            out_specs=[
                pl.BlockSpec((bb * ne, n_actions), lambda b: (b, 0)),
                pl.BlockSpec((bb * ne, D), lambda b: (b, 0)),
            ],
        ),
        compiler_params=pltpu.CompilerParams(
            dimension_semantics=("parallel",)),
    )(ents2d, bias, keep2d, w1t, b1, wint, woutt, bout, w2t, b2)

    # XLA-side glue: drop padding, keep agent rows only.
    q = q_full[:B * ne].reshape(B, ne, n_actions)[:, :n_agents]
    x2 = x2_full[:B * ne].reshape(B, ne, D)[:, :n_agents]
    q = q.reshape(bs, ts, n_agents, n_actions)
    return q, x2  # matches (q, attn_outs) of the torch module (attn_outs = relu output)


def reference_forward(entities, obs_mask, entity_mask, params, *, n_agents, n_heads):
    """Pure-JAX reference mirroring the PyTorch forward."""
    bs, ts, ne, ed = entities.shape
    B = bs * ts
    D = params['w1'].shape[0]
    head_dim = D // n_heads
    e = entities.reshape(B, ne, ed).astype(jnp.float32)
    om = obs_mask.reshape(B, ne, ne)[:, :n_agents, :].astype(bool)
    am = entity_mask.reshape(B, ne)[:, :n_agents].astype(bool)

    x1 = jax.nn.relu(e @ params['w1'].T + params['b1'])
    qkv = x1 @ params['win'].T
    q, k, v = jnp.split(qkv, 3, axis=-1)
    q = q[:, :n_agents]
    qh = q.reshape(B, n_agents, n_heads, head_dim).transpose(0, 2, 1, 3)
    kh = k.reshape(B, ne, n_heads, head_dim).transpose(0, 2, 1, 3)
    vh = v.reshape(B, ne, n_heads, head_dim).transpose(0, 2, 1, 3)
    logits = jnp.einsum('bhqd,bhkd->bhqk', qh, kh) / math.sqrt(float(head_dim))
    masked = jnp.where(om[:, None], -jnp.inf, logits)
    m = jnp.max(masked, axis=-1, keepdims=True)
    m_safe = jnp.where(jnp.isfinite(m), m, 0.0)
    p = jnp.where(om[:, None], 0.0, jnp.exp(masked - m_safe))
    denom = jnp.sum(p, axis=-1, keepdims=True)
    w = jnp.where(denom > 0.0, p / denom, 0.0)
    out = jnp.einsum('bhqk,bhkd->bhqd', w, vh)
    out = out.transpose(0, 2, 1, 3).reshape(B, n_agents, D)
    out = out @ params['wout'].T + params['bout']
    out = jnp.where(am[..., None], 0.0, out)
    x2 = jax.nn.relu(out)
    qq = x2 @ params['w2'].T + params['b2']
    qq = jnp.where(am[..., None], 0.0, qq)
    return qq.reshape(bs, ts, n_agents, -1), x2


if __name__ == "__main__":
    key = jax.random.PRNGKey(0)
    bs, ts, ne, ed = 2, 2, 8, 16          # batch, time, n_entities, entity feature dim
    n_agents, n_heads = 3, 4
    attn_embed_dim, n_actions = 32, 6

    ks = jax.random.split(key, 10)
    params = {
        'w1':   jax.random.normal(ks[0], (attn_embed_dim, ed), jnp.float32) * 0.1,
        'b1':   jax.random.normal(ks[1], (attn_embed_dim,), jnp.float32) * 0.1,
        'win':  jax.random.normal(ks[2], (3 * attn_embed_dim, attn_embed_dim), jnp.float32) * 0.1,
        'wout': jax.random.normal(ks[3], (attn_embed_dim, attn_embed_dim), jnp.float32) * 0.1,
        'bout': jax.random.normal(ks[4], (attn_embed_dim,), jnp.float32) * 0.1,
        'w2':   jax.random.normal(ks[5], (n_actions, attn_embed_dim), jnp.float32) * 0.1,
        'b2':   jax.random.normal(ks[6], (n_actions,), jnp.float32) * 0.1,
    }

    entities = jax.random.normal(ks[7], (bs, ts, ne, ed), jnp.float32)
    obs_mask = (jax.random.uniform(ks[8], (bs, ts, ne, ne)) < 0.3).astype(jnp.int32)
    entity_mask = (jax.random.uniform(ks[9], (bs, ts, ne)) < 0.2).astype(jnp.int32)

    # TODO(synk): EntityPoolingLayer (pooling_type != None) and the
    # ret_attn_logits branch are not implemented; this covers the default
    # attention path with ret_attn_logits=None and gt_obs_mask=False.

    q, x2 = entity_attention_ff_forward(entities, obs_mask, entity_mask, params,
                                        n_agents=n_agents, n_heads=n_heads)
    jax.block_until_ready((q, x2))

    q_ref, x2_ref = reference_forward(entities, obs_mask, entity_mask, params,
                                      n_agents=n_agents, n_heads=n_heads)
    # tolerance loosened slightly (vs 1e-4) for the approx-reciprocal softmax path
    assert jnp.allclose(q, q_ref, rtol=5e-3, atol=5e-3), "q mismatch"
    assert jnp.allclose(x2, x2_ref, rtol=5e-3, atol=5e-3), "attn_outs mismatch"

    print("KERNEL_OK")
</pallas_src>

<mosaic_0001>
module attributes {stable_mosaic.version = 11 : i64} {
  func.func @_agent_kernel(%arg0: i32, %arg1: memref<64x16xf32, #tpu.memory_space<vmem>>, %arg2: memref<8x8x8xf32, #tpu.memory_space<vmem>>, %arg3: memref<64x1xf32, #tpu.memory_space<vmem>>, %arg4: memref<16x32xf32, #tpu.memory_space<vmem>>, %arg5: memref<1x32xf32, #tpu.memory_space<vmem>>, %arg6: memref<32x96xf32, #tpu.memory_space<vmem>>, %arg7: memref<32x32xf32, #tpu.memory_space<vmem>>, %arg8: memref<1x32xf32, #tpu.memory_space<vmem>>, %arg9: memref<32x6xf32, #tpu.memory_space<vmem>>, %arg10: memref<1x6xf32, #tpu.memory_space<vmem>>, %arg11: memref<64x6xf32, #tpu.memory_space<vmem>>, %arg12: memref<64x32xf32, #tpu.memory_space<vmem>>) attributes {dimension_semantics = [#tpu.dimension_semantics<parallel>], iteration_bounds = array<i64: 1>, scalar_prefetch = 0 : i64, scratch_operands = 0 : i64, tpu.core_type = #tpu.core_type<tc>, window_params = [{transform_indices = @transform_0, window_bounds = array<i64: 64, 16>}, {transform_indices = @transform_1, window_bounds = array<i64: 8, 8, 8>}, {transform_indices = @transform_2, window_bounds = array<i64: 64, 1>}, {pipeline_mode = #tpu.pipeline_mode<synchronous>, transform_indices = @transform_3, window_bounds = array<i64: 16, 32>}, {pipeline_mode = #tpu.pipeline_mode<synchronous>, transform_indices = @transform_4, window_bounds = array<i64: 1, 32>}, {pipeline_mode = #tpu.pipeline_mode<synchronous>, transform_indices = @transform_5, window_bounds = array<i64: 32, 96>}, {pipeline_mode = #tpu.pipeline_mode<synchronous>, transform_indices = @transform_6, window_bounds = array<i64: 32, 32>}, {pipeline_mode = #tpu.pipeline_mode<synchronous>, transform_indices = @transform_7, window_bounds = array<i64: 1, 32>}, {pipeline_mode = #tpu.pipeline_mode<synchronous>, transform_indices = @transform_8, window_bounds = array<i64: 32, 6>}, {pipeline_mode = #tpu.pipeline_mode<synchronous>, transform_indices = @transform_9, window_bounds = array<i64: 1, 6>}, {transform_indices = @transform_10, window_bounds = array<i64: 64, 6>}, {transform_indices = @transform_11, window_bounds = array<i64: 64, 32>}]} {
    %c0 = arith.constant 0 : index
    %c0_0 = arith.constant 0 : index
    %0 = vector.load %arg1[%c0, %c0_0] : memref<64x16xf32, #tpu.memory_space<vmem>>, vector<64x16xf32>
    %c0_1 = arith.constant 0 : index
    %c0_2 = arith.constant 0 : index
    %1 = vector.load %arg4[%c0_1, %c0_2] : memref<16x32xf32, #tpu.memory_space<vmem>>, vector<16x32xf32>
    %cst = arith.constant dense<0.000000e+00> : vector<64x32xf32>
    %2 = tpu.matmul %0, %1, %cst {dimension_numbers = #tpu.dot_dimension_numbers<[1], [0], [0], [1], [0, 0, 1, 1], [], []>} : vector<64x16xf32>, vector<16x32xf32>, vector<64x32xf32> -> vector<64x32xf32>
    %c0_3 = arith.constant 0 : index
    %c0_4 = arith.constant 0 : index
    %3 = vector.load %arg5[%c0_3, %c0_4] : memref<1x32xf32, #tpu.memory_space<vmem>>, vector<1x32xf32>
    %4 = vector.broadcast %3 : vector<1x32xf32> to vector<64x32xf32>
    %5 = arith.addf %2, %4 : vector<64x32xf32>
    %cst_5 = arith.constant 0.000000e+00 : f32
    %6 = vector.broadcast %cst_5 : f32 to vector<64x32xf32>
    %7 = arith.maximumf %5, %6 : vector<64x32xf32>
    %c0_6 = arith.constant 0 : index
    %c0_7 = arith.constant 0 : index
    %8 = vector.load %arg6[%c0_6, %c0_7] : memref<32x96xf32, #tpu.memory_space<vmem>>, vector<32x96xf32>
    %cst_8 = arith.constant dense<0.000000e+00> : vector<64x96xf32>
    %9 = tpu.matmul %7, %8, %cst_8 {dimension_numbers = #tpu.dot_dimension_numbers<[1], [0], [0], [1], [0, 0, 1, 1], [], []>} : vector<64x32xf32>, vector<32x96xf32>, vector<64x96xf32> -> vector<64x96xf32>
    %10 = vector.extract_strided_slice %9 {offsets = [0, 0], sizes = [64, 32], strides = [1, 1]} : vector<64x96xf32> to vector<64x32xf32>
    %11 = vector.shape_cast %10 : vector<64x32xf32> to vector<8x8x32xf32>
    %12 = vector.extract_strided_slice %9 {offsets = [0, 32], sizes = [64, 32], strides = [1, 1]} : vector<64x96xf32> to vector<64x32xf32>
    %13 = vector.shape_cast %12 : vector<64x32xf32> to vector<8x8x32xf32>
    %14 = vector.extract_strided_slice %9 {offsets = [0, 64], sizes = [64, 32], strides = [1, 1]} : vector<64x96xf32> to vector<64x32xf32>
    %15 = vector.shape_cast %14 : vector<64x32xf32> to vector<8x8x32xf32>
    %c0_9 = arith.constant 0 : index
    %c0_10 = arith.constant 0 : index
    %c0_11 = arith.constant 0 : index
    %16 = vector.load %arg2[%c0_9, %c0_10, %c0_11] : memref<8x8x8xf32, #tpu.memory_space<vmem>>, vector<8x8x8xf32>
    %cst_12 = arith.constant dense<0xFF800000> : vector<8x8xf32>
    %17 = vector.multi_reduction <maximumf>, %16, %cst_12 [2] : vector<8x8x8xf32> to vector<8x8xf32>
    %18 = vector.shape_cast %17 : vector<8x8xf32> to vector<8x8x1xf32>
    %cst_13 = arith.constant -1.000000e+29 : f32
    %19 = vector.broadcast %cst_13 : f32 to vector<8x8x1xf32>
    %20 = arith.cmpf ogt, %18, %19 : vector<8x8x1xf32>
    %21 = vector.extract_strided_slice %11 {offsets = [0, 0, 0], sizes = [8, 8, 8], strides = [1, 1, 1]} : vector<8x8x32xf32> to vector<8x8x8xf32>
    %22 = vector.extract_strided_slice %13 {offsets = [0, 0, 0], sizes = [8, 8, 8], strides = [1, 1, 1]} : vector<8x8x32xf32> to vector<8x8x8xf32>
    "tpu.trace_start"() <{level = 10 : i32, message = "bqd,bkd->bqk"}> : () -> ()
    %cst_14 = arith.constant dense<0.000000e+00> : vector<8x8x8xf32>
    %23 = tpu.matmul %21, %22, %cst_14 {dimension_numbers = #tpu.dot_dimension_numbers<[2], [2], [1], [1], [0, 0, 0, 1, 1, 1], [0], [0]>} : vector<8x8x8xf32>, vector<8x8x8xf32>, vector<8x8x8xf32> -> vector<8x8x8xf32>
    "tpu.trace_stop"() : () -> ()
    %cst_15 = arith.constant 0.353553385 : f32
    %24 = vector.broadcast %cst_15 : f32 to vector<8x8x8xf32>
    %25 = arith.mulf %23, %24 : vector<8x8x8xf32>
    %26 = arith.addf %25, %16 : vector<8x8x8xf32>
    %cst_16 = arith.constant dense<0xFF800000> : vector<8x8xf32>
    %27 = vector.multi_reduction <maximumf>, %26, %cst_16 [2] : vector<8x8x8xf32> to vector<8x8xf32>
    %28 = vector.shape_cast %27 : vector<8x8xf32> to vector<8x8x1xf32>
    %29 = vector.broadcast %28 : vector<8x8x1xf32> to vector<8x8x8xf32>
    %30 = arith.subf %26, %29 : vector<8x8x8xf32>
    %31 = math.exp %30 : vector<8x8x8xf32>
    %cst_17 = arith.constant dense<0.000000e+00> : vector<8x8xf32>
    %32 = vector.multi_reduction <add>, %31, %cst_17 [2] : vector<8x8x8xf32> to vector<8x8xf32>
    %33 = vector.shape_cast %32 : vector<8x8xf32> to vector<8x8x1xf32>
    %34 = tpu.reciprocal %33 {approx = true} : vector<8x8x1xf32> -> vector<8x8x1xf32>
    %35 = vector.broadcast %34 : vector<8x8x1xf32> to vector<8x8x8xf32>
    %36 = arith.mulf %31, %35 : vector<8x8x8xf32>
    %cst_18 = arith.constant 0.000000e+00 : f32
    %37 = vector.shape_cast %20 : vector<8x8x1xi1> to vector<8x8x1xi1>
    %38 = vector.broadcast %37 : vector<8x8x1xi1> to vector<8x8x8xi1>
    %39 = vector.broadcast %cst_18 : f32 to vector<8x8x8xf32>
    %40 = arith.select %38, %36, %39 : vector<8x8x8xi1>, vector<8x8x8xf32>
    %41 = vector.extract_strided_slice %15 {offsets = [0, 0, 0], sizes = [8, 8, 8], strides = [1, 1, 1]} : vector<8x8x32xf32> to vector<8x8x8xf32>
    "tpu.trace_start"() <{level = 10 : i32, message = "bqk,bkd->bqd"}> : () -> ()
    %cst_19 = arith.constant dense<0.000000e+00> : vector<8x8x8xf32>
    %42 = tpu.matmul %40, %41, %cst_19 {dimension_numbers = #tpu.dot_dimension_numbers<[2], [1], [1], [2], [0, 0, 0, 1, 1, 2], [0], [0]>} : vector<8x8x8xf32>, vector<8x8x8xf32>, vector<8x8x8xf32> -> vector<8x8x8xf32>
    "tpu.trace_stop"() : () -> ()
    %43 = vector.extract_strided_slice %11 {offsets = [0, 0, 8], sizes = [8, 8, 8], strides = [1, 1, 1]} : vector<8x8x32xf32> to vector<8x8x8xf32>
    %44 = vector.extract_strided_slice %13 {offsets = [0, 0, 8], sizes = [8, 8, 8], strides = [1, 1, 1]} : vector<8x8x32xf32> to vector<8x8x8xf32>
    "tpu.trace_start"() <{level = 10 : i32, message = "bqd,bkd->bqk"}> : () -> ()
    %cst_20 = arith.constant dense<0.000000e+00> : vector<8x8x8xf32>
    %45 = tpu.matmul %43, %44, %cst_20 {dimension_numbers = #tpu.dot_dimension_numbers<[2], [2], [1], [1], [0, 0, 0, 1, 1, 1], [0], [0]>} : vector<8x8x8xf32>, vector<8x8x8xf32>, vector<8x8x8xf32> -> vector<8x8x8xf32>
    "tpu.trace_stop"() : () -> ()
    %cst_21 = arith.constant 0.353553385 : f32
    %46 = vector.broadcast %cst_21 : f32 to vector<8x8x8xf32>
    %47 = arith.mulf %45, %46 : vector<8x8x8xf32>
    %48 = arith.addf %47, %16 : vector<8x8x8xf32>
    %cst_22 = arith.constant dense<0xFF800000> : vector<8x8xf32>
    %49 = vector.multi_reduction <maximumf>, %48, %cst_22 [2] : vector<8x8x8xf32> to vector<8x8xf32>
    %50 = vector.shape_cast %49 : vector<8x8xf32> to vector<8x8x1xf32>
    %51 = vector.broadcast %50 : vector<8x8x1xf32> to vector<8x8x8xf32>
    %52 = arith.subf %48, %51 : vector<8x8x8xf32>
    %53 = math.exp %52 : vector<8x8x8xf32>
    %cst_23 = arith.constant dense<0.000000e+00> : vector<8x8xf32>
    %54 = vector.multi_reduction <add>, %53, %cst_23 [2] : vector<8x8x8xf32> to vector<8x8xf32>
    %55 = vector.shape_cast %54 : vector<8x8xf32> to vector<8x8x1xf32>
    %56 = tpu.reciprocal %55 {approx = true} : vector<8x8x1xf32> -> vector<8x8x1xf32>
    %57 = vector.broadcast %56 : vector<8x8x1xf32> to vector<8x8x8xf32>
    %58 = arith.mulf %53, %57 : vector<8x8x8xf32>
    %cst_24 = arith.constant 0.000000e+00 : f32
    %59 = vector.shape_cast %20 : vector<8x8x1xi1> to vector<8x8x1xi1>
    %60 = vector.broadcast %59 : vector<8x8x1xi1> to vector<8x8x8xi1>
    %61 = vector.broadcast %cst_24 : f32 to vector<8x8x8xf32>
    %62 = arith.select %60, %58, %61 : vector<8x8x8xi1>, vector<8x8x8xf32>
    %63 = vector.extract_strided_slice %15 {offsets = [0, 0, 8], sizes = [8, 8, 8], strides = [1, 1, 1]} : vector<8x8x32xf32> to vector<8x8x8xf32>
    "tpu.trace_start"() <{level = 10 : i32, message = "bqk,bkd->bqd"}> : () -> ()
    %cst_25 = arith.constant dense<0.000000e+00> : vector<8x8x8xf32>
    %64 = tpu.matmul %62, %63, %cst_25 {dimension_numbers = #tpu.dot_dimension_numbers<[2], [1], [1], [2], [0, 0, 0, 1, 1, 2], [0], [0]>} : vector<8x8x8xf32>, vector<8x8x8xf32>, vector<8x8x8xf32> -> vector<8x8x8xf32>
    "tpu.trace_stop"() : () -> ()
    %65 = vector.extract_strided_slice %11 {offsets = [0, 0, 16], sizes = [8, 8, 8], strides = [1, 1, 1]} : vector<8x8x32xf32> to vector<8x8x8xf32>
    %66 = vector.extract_strided_slice %13 {offsets = [0, 0, 16], sizes = [8, 8, 8], strides = [1, 1, 1]} : vector<8x8x32xf32> to vector<8x8x8xf32>
    "tpu.trace_start"() <{level = 10 : i32, message = "bqd,bkd->bqk"}> : () -> ()
    %cst_26 = arith.constant dense<0.000000e+00> : vector<8x8x8xf32>
    %67 = tpu.matmul %65, %66, %cst_26 {dimension_numbers = #tpu.dot_dimension_numbers<[2], [2], [1], [1], [0, 0, 0, 1, 1, 1], [0], [0]>} : vector<8x8x8xf32>, vector<8x8x8xf32>, vector<8x8x8xf32> -> vector<8x8x8xf32>
    "tpu.trace_stop"() : () -> ()
    %cst_27 = arith.constant 0.353553385 : f32
    %68 = vector.broadcast %cst_27 : f32 to vector<8x8x8xf32>
    %69 = arith.mulf %67, %68 : vector<8x8x8xf32>
    %70 = arith.addf %69, %16 : vector<8x8x8xf32>
    %cst_28 = arith.constant dense<0xFF800000> : vector<8x8xf32>
    %71 = vector.multi_reduction <maximumf>, %70, %cst_28 [2] : vector<8x8x8xf32> to vector<8x8xf32>
    %72 = vector.shape_cast %71 : vector<8x8xf32> to vector<8x8x1xf32>
    %73 = vector.broadcast %72 : vector<8x8x1xf32> to vector<8x8x8xf32>
    %74 = arith.subf %70, %73 : vector<8x8x8xf32>
    %75 = math.exp %74 : vector<8x8x8xf32>
    %cst_29 = arith.constant dense<0.000000e+00> : vector<8x8xf32>
    %76 = vector.multi_reduction <add>, %75, %cst_29 [2] : vector<8x8x8xf32> to vector<8x8xf32>
    %77 = vector.shape_cast %76 : vector<8x8xf32> to vector<8x8x1xf32>
    %78 = tpu.reciprocal %77 {approx = true} : vector<8x8x1xf32> -> vector<8x8x1xf32>
    %79 = vector.broadcast %78 : vector<8x8x1xf32> to vector<8x8x8xf32>
    %80 = arith.mulf %75, %79 : vector<8x8x8xf32>
    %cst_30 = arith.constant 0.000000e+00 : f32
    %81 = vector.shape_cast %20 : vector<8x8x1xi1> to vector<8x8x1xi1>
    %82 = vector.broadcast %81 : vector<8x8x1xi1> to vector<8x8x8xi1>
    %83 = vector.broadcast %cst_30 : f32 to vector<8x8x8xf32>
    %84 = arith.select %82, %80, %83 : vector<8x8x8xi1>, vector<8x8x8xf32>
    %85 = vector.extract_strided_slice %15 {offsets = [0, 0, 16], sizes = [8, 8, 8], strides = [1, 1, 1]} : vector<8x8x32xf32> to vector<8x8x8xf32>
    "tpu.trace_start"() <{level = 10 : i32, message = "bqk,bkd->bqd"}> : () -> ()
    %cst_31 = arith.constant dense<0.000000e+00> : vector<8x8x8xf32>
    %86 = tpu.matmul %84, %85, %cst_31 {dimension_numbers = #tpu.dot_dimension_numbers<[2], [1], [1], [2], [0, 0, 0, 1, 1, 2], [0], [0]>} : vector<8x8x8xf32>, vector<8x8x8xf32>, vector<8x8x8xf32> -> vector<8x8x8xf32>
    "tpu.trace_stop"() : () -> ()
    %87 = vector.extract_strided_slice %11 {offsets = [0, 0, 24], sizes = [8, 8, 8], strides = [1, 1, 1]} : vector<8x8x32xf32> to vector<8x8x8xf32>
    %88 = vector.extract_strided_slice %13 {offsets = [0, 0, 24], sizes = [8, 8, 8], strides = [1, 1, 1]} : vector<8x8x32xf32> to vector<8x8x8xf32>
    "tpu.trace_start"() <{level = 10 : i32, message = "bqd,bkd->bqk"}> : () -> ()
    %cst_32 = arith.constant dense<0.000000e+00> : vector<8x8x8xf32>
    %89 = tpu.matmul %87, %88, %cst_32 {dimension_numbers = #tpu.dot_dimension_numbers<[2], [2], [1], [1], [0, 0, 0, 1, 1, 1], [0], [0]>} : vector<8x8x8xf32>, vector<8x8x8xf32>, vector<8x8x8xf32> -> vector<8x8x8xf32>
    "tpu.trace_stop"() : () -> ()
    %cst_33 = arith.constant 0.353553385 : f32
    %90 = vector.broadcast %cst_33 : f32 to vector<8x8x8xf32>
    %91 = arith.mulf %89, %90 : vector<8x8x8xf32>
    %92 = arith.addf %91, %16 : vector<8x8x8xf32>
    %cst_34 = arith.constant dense<0xFF800000> : vector<8x8xf32>
    %93 = vector.multi_reduction <maximumf>, %92, %cst_34 [2] : vector<8x8x8xf32> to vector<8x8xf32>
    %94 = vector.shape_cast %93 : vector<8x8xf32> to vector<8x8x1xf32>
    %95 = vector.broadcast %94 : vector<8x8x1xf32> to vector<8x8x8xf32>
    %96 = arith.subf %92, %95 : vector<8x8x8xf32>
    %97 = math.exp %96 : vector<8x8x8xf32>
    %cst_35 = arith.constant dense<0.000000e+00> : vector<8x8xf32>
    %98 = vector.multi_reduction <add>, %97, %cst_35 [2] : vector<8x8x8xf32> to vector<8x8xf32>
    %99 = vector.shape_cast %98 : vector<8x8xf32> to vector<8x8x1xf32>
    %100 = tpu.reciprocal %99 {approx = true} : vector<8x8x1xf32> -> vector<8x8x1xf32>
    %101 = vector.broadcast %100 : vector<8x8x1xf32> to vector<8x8x8xf32>
    %102 = arith.mulf %97, %101 : vector<8x8x8xf32>
    %cst_36 = arith.constant 0.000000e+00 : f32
    %103 = vector.shape_cast %20 : vector<8x8x1xi1> to vector<8x8x1xi1>
    %104 = vector.broadcast %103 : vector<8x8x1xi1> to vector<8x8x8xi1>
    %105 = vector.broadcast %cst_36 : f32 to vector<8x8x8xf32>
    %106 = arith.select %104, %102, %105 : vector<8x8x8xi1>, vector<8x8x8xf32>
    %107 = vector.extract_strided_slice %15 {offsets = [0, 0, 24], sizes = [8, 8, 8], strides = [1, 1, 1]} : vector<8x8x32xf32> to vector<8x8x8xf32>
    "tpu.trace_start"() <{level = 10 : i32, message = "bqk,bkd->bqd"}> : () -> ()
    %cst_37 = arith.constant dense<0.000000e+00> : vector<8x8x8xf32>
    %108 = tpu.matmul %106, %107, %cst_37 {dimension_numbers = #tpu.dot_dimension_numbers<[2], [1], [1], [2], [0, 0, 0, 1, 1, 2], [0], [0]>} : vector<8x8x8xf32>, vector<8x8x8xf32>, vector<8x8x8xf32> -> vector<8x8x8xf32>
    "tpu.trace_stop"() : () -> ()
    %109 = tpu.concatenate %42, %64, %86, %108 in 2 : vector<8x8x8xf32>, vector<8x8x8xf32>, vector<8x8x8xf32>, vector<8x8x8xf32> -> vector<8x8x32xf32>
    %110 = vector.shape_cast %109 : vector<8x8x32xf32> to vector<64x32xf32>
    %c0_38 = arith.constant 0 : index
    %c0_39 = arith.constant 0 : index
    %111 = vector.load %arg3[%c0_38, %c0_39] : memref<64x1xf32, #tpu.memory_space<vmem>>, vector<64x1xf32>
    %c0_40 = arith.constant 0 : index
    %c0_41 = arith.constant 0 : index
    %112 = vector.load %arg7[%c0_40, %c0_41] : memref<32x32xf32, #tpu.memory_space<vmem>>, vector<32x32xf32>
    %cst_42 = arith.constant dense<0.000000e+00> : vector<64x32xf32>
    %113 = tpu.matmul %110, %112, %cst_42 {dimension_numbers = #tpu.dot_dimension_numbers<[1], [0], [0], [1], [0, 0, 1, 1], [], []>} : vector<64x32xf32>, vector<32x32xf32>, vector<64x32xf32> -> vector<64x32xf32>
    %c0_43 = arith.constant 0 : index
    %c0_44 = arith.constant 0 : index
    %114 = vector.load %arg8[%c0_43, %c0_44] : memref<1x32xf32, #tpu.memory_space<vmem>>, vector<1x32xf32>
    %115 = vector.broadcast %114 : vector<1x32xf32> to vector<64x32xf32>
    %116 = arith.addf %113, %115 : vector<64x32xf32>
    %117 = vector.broadcast %111 : vector<64x1xf32> to vector<64x32xf32>
    %118 = arith.mulf %116, %117 : vector<64x32xf32>
    %cst_45 = arith.constant 0.000000e+00 : f32
    %119 = vector.broadcast %cst_45 : f32 to vector<64x32xf32>
    %120 = arith.maximumf %118, %119 : vector<64x32xf32>
    %c0_46 = arith.constant 0 : index
    %c0_47 = arith.constant 0 : index
    %121 = vector.load %arg9[%c0_46, %c0_47] : memref<32x6xf32, #tpu.memory_space<vmem>>, vector<32x6xf32>
    %cst_48 = arith.constant dense<0.000000e+00> : vector<64x6xf32>
    %122 = tpu.matmul %120, %121, %cst_48 {dimension_numbers = #tpu.dot_dimension_numbers<[1], [0], [0], [1], [0, 0, 1, 1], [], []>} : vector<64x32xf32>, vector<32x6xf32>, vector<64x6xf32> -> vector<64x6xf32>
    %c0_49 = arith.constant 0 : index
    %c0_50 = arith.constant 0 : index
    %123 = vector.load %arg10[%c0_49, %c0_50] : memref<1x6xf32, #tpu.memory_space<vmem>>, vector<1x6xf32>
    %124 = vector.broadcast %123 : vector<1x6xf32> to vector<64x6xf32>
    %125 = arith.addf %122, %124 : vector<64x6xf32>
    %126 = vector.broadcast %111 : vector<64x1xf32> to vector<64x6xf32>
    %127 = arith.mulf %125, %126 : vector<64x6xf32>
    %c0_51 = arith.constant 0 : index
    %c0_52 = arith.constant 0 : index
    %128 = vector.load %arg12[%c0_51, %c0_52] : memref<64x32xf32, #tpu.memory_space<vmem>>, vector<64x32xf32>
    tpu.vector_store %arg12[%c0_51, %c0_52], %120 {strides = array<i32>} : memref<64x32xf32, #tpu.memory_space<vmem>>, vector<64x32xf32>,
    %c0_53 = arith.constant 0 : index
    %c0_54 = arith.constant 0 : index
    %129 = vector.load %arg11[%c0_53, %c0_54] : memref<64x6xf32, #tpu.memory_space<vmem>>, vector<64x6xf32>
    tpu.vector_store %arg11[%c0_53, %c0_54], %127 {strides = array<i32>} : memref<64x6xf32, #tpu.memory_space<vmem>>, vector<64x6xf32>,
    return
  }
  func.func @transform_0(%arg0: i32) -> (i32, i32) {
    %c0_i32 = arith.constant 0 : i32
    %c0_i32_0 = arith.constant 0 : i32
    return %arg0, %c0_i32 : i32, i32
  }
  func.func @transform_1(%arg0: i32) -> (i32, i32, i32) {
    %c0_i32 = arith.constant 0 : i32
    %c0_i32_0 = arith.constant 0 : i32
    %c0_i32_1 = arith.constant 0 : i32
    return %arg0, %c0_i32, %c0_i32_0 : i32, i32, i32
  }
  func.func @transform_2(%arg0: i32) -> (i32, i32) {
    %c0_i32 = arith.constant 0 : i32
    %c0_i32_0 = arith.constant 0 : i32
    return %arg0, %c0_i32 : i32, i32
  }
  func.func @transform_3(%arg0: i32) -> (i32, i32) {
    %c0_i32 = arith.constant 0 : i32
    %c0_i32_0 = arith.constant 0 : i32
    %c0_i32_1 = arith.constant 0 : i32
    return %c0_i32, %c0_i32_0 : i32, i32
  }
  func.func @transform_4(%arg0: i32) -> (i32, i32) {
    %c0_i32 = arith.constant 0 : i32
    %c0_i32_0 = arith.constant 0 : i32
    %c0_i32_1 = arith.constant 0 : i32
    return %c0_i32, %c0_i32_0 : i32, i32
  }
  func.func @transform_5(%arg0: i32) -> (i32, i32) {
    %c0_i32 = arith.constant 0 : i32
    %c0_i32_0 = arith.constant 0 : i32
    %c0_i32_1 = arith.constant 0 : i32
    return %c0_i32, %c0_i32_0 : i32, i32
  }
  func.func @transform_6(%arg0: i32) -> (i32, i32) {
    %c0_i32 = arith.constant 0 : i32
    %c0_i32_0 = arith.constant 0 : i32
    %c0_i32_1 = arith.constant 0 : i32
    return %c0_i32, %c0_i32_0 : i32, i32
  }
  func.func @transform_7(%arg0: i32) -> (i32, i32) {
    %c0_i32 = arith.constant 0 : i32
    %c0_i32_0 = arith.constant 0 : i32
    %c0_i32_1 = arith.constant 0 : i32
    return %c0_i32, %c0_i32_0 : i32, i32
  }
  func.func @transform_8(%arg0: i32) -> (i32, i32) {
    %c0_i32 = arith.constant 0 : i32
    %c0_i32_0 = arith.constant 0 : i32
    %c0_i32_1 = arith.constant 0 : i32
    return %c0_i32, %c0_i32_0 : i32, i32
  }
  func.func @transform_9(%arg0: i32) -> (i32, i32) {
    %c0_i32 = arith.constant 0 : i32
    %c0_i32_0 = arith.constant 0 : i32
    %c0_i32_1 = arith.constant 0 : i32
    return %c0_i32, %c0_i32_0 : i32, i32
  }
  func.func @transform_10(%arg0: i32) -> (i32, i32) {
    %c0_i32 = arith.constant 0 : i32
    %c0_i32_0 = arith.constant 0 : i32
    return %arg0, %c0_i32 : i32, i32
  }
  func.func @transform_11(%arg0: i32) -> (i32, i32) {
    %c0_i32 = arith.constant 0 : i32
    %c0_i32_0 = arith.constant 0 : i32
    return %arg0, %c0_i32 : i32, i32
  }
}

</mosaic_0001>

<bundles_post_ra>
// kernel: tpu_custom_call.1
= control target key start
LH: loop header
LB: loop body
LE: loop exit
PB: predicated region body
PF: predicated region fallthrough
CT: control target
= control target key end

     0   :  { %vm54_vm0 = vcmask 130048   ;;  %vm196_vm1 = vcmask 261120   ;;  %v8520_v42 = vmov 0.0   ;;  %vm7134_vm2 = vmmov 0   ;;  %s7136_s21 = smov 64   ;;  %s7137_s22 = smov 88   ;;  %s8508_s3 = inlined_call_operand.vmem [shape: f32[16,32], index: 3, kind: input, shape index: {}]   ;;  %s8509_s0 = inlined_call_operand.vmem [shape: f32[64,16], index: 0, kind: input, shape index: {}]   ;;  %s8510_s5 = inlined_call_operand.vmem [shape: f32[32,96], index: 5, kind: input, shape index: {}]   ;;  %s8511_s4 = inlined_call_operand.vmem [shape: f32[1,32], index: 4, kind: input, shape index: {}]   ;;  %s8512_s1 = inlined_call_operand.vmem [shape: f32[8,8,8], index: 1, kind: input, shape index: {}]   ;;  %s8513_s6 = inlined_call_operand.vmem [shape: f32[32,32], index: 6, kind: input, shape index: {}]   ;;  %s8514_s2 = inlined_call_operand.vmem [shape: f32[64,1], index: 2, kind: input, shape index: {}]   ;;  %s8515_s8 = inlined_call_operand.vmem [shape: f32[32,6], index: 8, kind: input, shape index: {}]   ;;  %s8516_s7 = inlined_call_operand.vmem [shape: f32[1,32], index: 7, kind: input, shape index: {}]   ;;  %s8517_s11 = inlined_call_operand.vmem [shape: f32[64,32], index: 11, kind: output, shape index: {1}]   ;;  %s8518_s9 = inlined_call_operand.vmem [shape: f32[1,6], index: 9, kind: input, shape index: {}]   ;;  %s8519_s10 = inlined_call_operand.vmem [shape: f32[64,6], index: 10, kind: output, shape index: {0}]  }
   0x1   :  { %v45_v0 = vld [vmem:[%s8508_s3] sm:$0xff]  ;;  %v46_v1 = vld [vmem:[%s8508_s3 + $0x8] sm:$0xff]  ;;  %v39_v8 = vld [vmem:[%s8509_s0 + $0x10] sm:$0xff]  ;;  %vm334_vm3 = vcmask 64512   ;;  %s7138_s23 = smov 120   ;;  %s7139_s24 = smov 56  }
   0x2   :  { %v37_v2 = vld [vmem:[%s8509_s0] sm:$0xff]  ;;  %v6950_v3 = vpack.c.bf16 %v46_v1, %v45_v0  ;;  %v193_v5 = vld [vmem:[%s8510_s5 + $0x8] sm:$0xff]  ;;  %v40_v9 = vld [vmem:[%s8509_s0 + $0x18] sm:$0xff]  ;;  %s7140_s25 = smov 80   ;;  %s7141_s26 = smov 112   ;;  %vm5863_vm12 = vcmask 195584  }
   0x3   :  { %6558 = vmatprep.mubr.msk.f32.mxu0 %vm54_vm0, %v37_v2  ;;  %v192_v4 = vld [vmem:[%s8510_s5] sm:$0xff]  ;;  %v38_v6 = vld [vmem:[%s8509_s0 + $0x8] sm:$0xff]  ;;  %v43_v12 = vld [vmem:[%s8509_s0 + $0x30] sm:$0xff]  ;;  %s7148_s29 = smov 24   ;;  %vm6232_vm13 = vcmask 48128  }
   0x4   :  { %6951 = vmatprep.subr.bf16.mxu0 %v6950_v3  ;;  %v6954_v7 = vpack.c.bf16 %v193_v5, %v192_v4  ;;  %v41_v10 = vld [vmem:[%s8509_s0 + $0x20] sm:$0xff]  ;;  %v42_v11 = vld [vmem:[%s8509_s0 + $0x28] sm:$0xff]  ;;  %v44_v13 = vld [vmem:[%s8509_s0 + $0x38] sm:$0xff]  ;;  %s7135_s0 = smov 96  }
   0x5   :  { %6953 = vmatpush3.bf16.msra.mxu0 %v6950_v3  ;;  %v194_v14 = vld [vmem:[%s8510_s5 + $0x10] sm:$0xff]  ;;  %v195_v15 = vld [vmem:[%s8510_s5 + $0x18] sm:$0xff]  ;;  %v6249_v17 = vld [vmem:[%s8511_s4] ss:$0 sm:$0xff]  ;;  %s7143_s4 = smov 72   ;;  %s7144_s5 = smov 104  }
   0x6   :  { %6955 = vmatprep.subr.bf16.mxu1 %v6954_v7  ;;  %v6958_v16 = vpack.c.bf16 %v195_v15, %v194_v14  ;;  %6590 = vmatprep.subr.mxu0 %v8520_v42  ;;  %v7304_v51 = vld [vmem:[%s8512_s1 + $0x8] sm:$0xff]  ;;  %v7311_v53 = vld [vmem:[%s8512_s1 + $0x18] sm:$0xff]  ;;  %v7318_v55 = vld [vmem:[%s8512_s1] sm:$0xff] }
   0x7   :  { %6957 = vmatpush3.bf16.msra.mxu1 %v6954_v7  ;;  %v338_v52 = vsel %vm334_vm3, %v7304_v51, -inf  ;;  %v344_v54 = vsel %vm334_vm3, %v7311_v53, -inf  ;;  %v335_v56 = vsel %vm334_vm3, %v7318_v55, -inf  ;;  %v7325_v57 = vld [vmem:[%s8512_s1 + $0x10] sm:$0xff]  ;;  %v7380_v3 = vld [vmem:[%s8512_s1 + $0x20] sm:$0xff]  ;;  %v7385_v4 = vld [vmem:[%s8512_s1 + $0x28] sm:$0xff] }
   0x8   :  { %6559 = vmatmul.mubr.msk.f32.vlgmr.msra.gmra.mrb[0].mxu0 %vm54_vm0, %v38_v6  ;;  %6959 = vmatprep.subr.bf16.mxu1 %v6958_v16  ;;  %v341_v58 = vsel %vm334_vm3, %v7325_v57, -inf  ;;  %v347_v5 = vsel %vm334_vm3, %v7380_v3, -inf  ;;  %v350_v6 = vsel %vm334_vm3, %v7385_v4, -inf  ;;  %v7394_v7 = vld [vmem:[%s8512_s1 + $0x30] sm:$0xff] }
   0x9   :  { %6561 = vmatprep.mubr.msk.f32.mxu0 %vm54_vm0, %v39_v8  ;;  %v353_v8 = vsel %vm334_vm3, %v7394_v7, -inf }
   0xb   :  { %6961 = vmatpush3.bf16.msra.mxu1 %v6958_v16 }
   0xc   :  { %6562 = vmatmul.mubr.msk.f32.gmra.mrb[2].mxu0 %vm54_vm0, %v40_v9  ;;  %6600 = vmatprep.subr.mxu1 %v8520_v42 }
   0xd   :  { %6564 = vmatprep.mubr.msk.f32.mxu0 %vm54_vm0, %v41_v10 }
  0x10   :  { %6565 = vmatmul.mubr.msk.f32.gmra.mrb[4].mxu0 %vm54_vm0, %v42_v11 }
  0x11   :  { %6567 = vmatprep.mubr.msk.f32.mxu0 %vm54_vm0, %v43_v12 }
  0x14   :  { %6568 = vmatmul.mubr.msk.f32.gmra.mrb[6].mxu0 %vm54_vm0, %v44_v13 }
  0x15   :  { %6592 = vmatprep.mubr.msk.f32.mxu0 %vm7134_vm2, %v8520_v42 }
  0xdb   :  { %v6560_v18 = vpop.f32.mrb[0].mxu0 }
  0xdc   :  { %v151_v19 = vadd.f32 %v6560_v18, %v6249_v17  ;;  %v145_v20 = vpop.f32.mrb[1].mxu0 }
  0xdd   :  { %v146_v21 = vadd.f32 %v6249_v17, %v145_v20 }
  0xde   :  { %v185_v24 = vmax.f32 %v151_v19, 0.0 }
  0xdf   :  { %v184_v22 = vmax.f32 %v146_v21, 0.0  ;;  %v6563_v23 = vpop.f32.mrb[2].mxu0 }
  0xe0   :  { %v161_v25 = vadd.f32 %v6563_v23, %v6249_v17  ;;  %v155_v26 = vpop.f32.mrb[3].mxu0 }
  0xe1   :  { %v156_v27 = vadd.f32 %v6249_v17, %v155_v26  ;;  %6578 = vmatprep.mubr.msk.f32.mxu1 %vm196_vm1, %v184_v22 }
  0xe2   :  { %6579 = vmatmul.mubr.msk.f32.vlgmr.msra.gmra.mrb[0].mxu1 %vm196_vm1, %v185_v24  ;;  %v187_v30 = vmax.f32 %v161_v25, 0.0 }
  0xe3   :  { %v186_v28 = vmax.f32 %v156_v27, 0.0  ;;  %v6566_v29 = vpop.f32.mrb[4].mxu0 }
  0xe4   :  { %v171_v31 = vadd.f32 %v6566_v29, %v6249_v17  ;;  %v165_v32 = vpop.f32.mrb[5].mxu0 }
  0xe5   :  { %v166_v33 = vadd.f32 %v6249_v17, %v165_v32  ;;  %6581 = vmatprep.mubr.msk.f32.mxu1 %vm196_vm1, %v186_v28 }
  0xe6   :  { %6582 = vmatmul.mubr.msk.f32.gmra.mrb[2].mxu1 %vm196_vm1, %v187_v30  ;;  %v189_v36 = vmax.f32 %v171_v31, 0.0 }
  0xe7   :  { %v188_v34 = vmax.f32 %v166_v33, 0.0  ;;  %v6569_v35 = vpop.f32.mrb[6].mxu0 }
  0xe8   :  { %v181_v37 = vadd.f32 %v6569_v35, %v6249_v17  ;;  %v175_v38 = vpop.f32.mrb[7].mxu0 }
  0xe9   :  { %v176_v39 = vadd.f32 %v6249_v17, %v175_v38  ;;  %6584 = vmatprep.mubr.msk.f32.mxu1 %vm196_vm1, %v188_v34 }
  0xea   :  { %v191_v40 = vmax.f32 %v181_v37, 0.0  ;;  %6585 = vmatmul.mubr.msk.f32.gmra.mrb[4].mxu1 %vm196_vm1, %v189_v36 }
  0xeb   :  { %v190_v41 = vmax.f32 %v176_v39, 0.0 }
  0xed   :  { %6587 = vmatprep.mubr.msk.f32.mxu1 %vm196_vm1, %v190_v41 }
  0xee   :  { %6588 = vmatmul.mubr.msk.f32.gmra.mrb[6].mxu1 %vm196_vm1, %v191_v40 }
  0xef   :  { %6602 = vmatprep.mubr.msk.f32.mxu1 %vm7134_vm2, %v8520_v42 }
 0x1b5   :  { %v7277_v43 = vpop.f32.mrb[0].mxu1 }
 0x1b6   :  { %v7279_v44 = vpop.f32.mrb[1].mxu1 }
 0x1b7   :  { %368 = vrot.lane.b32.xlu0 %v7279_v44, %s7135_s0 }
 0x1b9   :  { %v7282_v45 = vpop.f32.mrb[2].mxu1 }
 0x1ba   :  { %v7284_v46 = vpop.f32.mrb[3].mxu1 }
 0x1bb   :  { %445 = vrot.lane.b32.xlu0 %v7277_v43, %s7135_s0  ;;  %522 = vrot.lane.b32.xlu1 %v7284_v46, %s7135_s0 }
 0x1bd   :  { %v7288_v47 = vpop.f32.mrb[4].mxu1 }
 0x1be   :  { %v7290_v48 = vpop.f32.mrb[5].mxu1 }
 0x1bf   :  { %599 = vrot.lane.b32.xlu1 %v7282_v45, %s7135_s0  ;;  %676 = vrot.lane.b32.xlu0 %v7290_v48, %s7135_s0 }
 0x1c1   :  { %v7294_v49 = vpop.f32.mrb[6].mxu1 }
 0x1c2   :  { %v7296_v50 = vpop.f32.mrb[7].mxu1 }
 0x1c3   :  { %753 = vrot.lane.b32.xlu1 %v7288_v47, %s7135_s0  ;;  %830 = vrot.lane.b32.xlu0 %v7296_v50, %s7135_s0 }
 0x1c7   :  { %907 = vrot.lane.b32.xlu1 %v7294_v49, %s7135_s0  ;;  %s7142_s0 = smov 48  }
 0x1e2   :  { %339 = vmax.xlane.f32.xlu0 %v338_v52 }
 0x1e6   :  { %345 = vmax.xlane.f32.xlu0 %v344_v54  ;;  %v7432_v54 = vld [vmem:[%s8512_s1 + $0x38] sm:$0xff] }
 0x1ea   :  { %351 = vmax.xlane.f32.xlu0 %v350_v6 }
 0x1eb   :  { %336 = vmax.xlane.f32.xlu1 %v335_v56 }
 0x1ef   :  { %342 = vmax.xlane.f32.xlu1 %v341_v58 }
 0x1f3   :  { %348 = vmax.xlane.f32.xlu1 %v347_v5 }
 0x1f7   :  { %354 = vmax.xlane.f32.xlu1 %v353_v8 }
 0x229   :  { %v369_v59 = vpop.permute.xlu0 %368 }
 0x22a   :  { %6591 = vmatpush3.xpose.msk.msra.mxu0 %vm334_vm3, %v369_v59 }
 0x22b   :  { %6595 = vmatprep.subr.mxu0 %v8520_v42 }
 0x22d   :  { %6593 = vmatmul.mubr.msk.f32.vlgmr.msra.gmra.mrb[8].mxu0 %vm334_vm3, %v7279_v44  ;;  %v446_v60 = vpop.permute.xlu0 %445  ;;  %v523_v61 = vpop.permute.xlu1 %522 }
 0x22e   :  { %6596 = vmatpush3.xpose.msk.msra.mxu0 %vm334_vm3, %v446_v60  ;;  %6601 = vmatpush3.xpose.msk.msra.mxu1 %vm334_vm3, %v523_v61 }
 0x22f   :  { %6597 = vmatprep.mubr.msk.f32.mxu0 %vm7134_vm2, %v8520_v42  ;;  %6605 = vmatprep.subr.mxu0 %v8520_v42 }
 0x230   :  { %6610 = vmatprep.subr.mxu1 %v8520_v42 }
 0x231   :  { %6598 = vmatmul.mubr.msk.f32.vlgmr.msra.gmra.mrb[10].mxu0 %vm334_vm3, %v7277_v43  ;;  %6603 = vmatmul.mubr.msk.f32.vlgmr.msra.gmra.mrb[8].mxu1 %vm334_vm3, %v7284_v46  ;;  %v600_v62 = vpop.permute.xlu1 %599  ;;  %v677_v63 = vpop.permute.xlu0 %676 }
 0x232   :  { %6606 = vmatpush3.xpose.msk.msra.mxu0 %vm334_vm3, %v600_v62  ;;  %6611 = vmatpush3.xpose.msk.msra.mxu1 %vm334_vm3, %v677_v63  ;;  %v356_v63 = vsel %vm334_vm3, %v7432_v54, -inf }
 0x233   :  { %6607 = vmatprep.mubr.msk.f32.mxu0 %vm7134_vm2, %v8520_v42  ;;  %6612 = vmatprep.mubr.msk.f32.mxu1 %vm7134_vm2, %v8520_v42 }
 0x234   :  { %6615 = vmatprep.subr.mxu0 %v8520_v42  ;;  %6620 = vmatprep.subr.mxu1 %v8520_v42 }
 0x235   :  { %6608 = vmatmul.mubr.msk.f32.vlgmr.msra.gmra.mrb[12].mxu0 %vm334_vm3, %v7282_v45  ;;  %v754_v0 = vpop.permute.xlu1 %753  ;;  %6613 = vmatmul.mubr.msk.f32.vlgmr.msra.gmra.mrb[10].mxu1 %vm334_vm3, %v7290_v48  ;;  %v831_v1 = vpop.permute.xlu0 %830 }
 0x236   :  { %6616 = vmatpush3.xpose.msk.msra.mxu0 %vm334_vm3, %v754_v0  ;;  %6621 = vmatpush3.xpose.msk.msra.mxu1 %vm334_vm3, %v831_v1 }
 0x237   :  { %6617 = vmatprep.mubr.msk.f32.mxu0 %vm7134_vm2, %v8520_v42  ;;  %6622 = vmatprep.mubr.msk.f32.mxu1 %vm7134_vm2, %v8520_v42 }
 0x238   :  { %6625 = vmatprep.subr.mxu0 %v8520_v42  ;;  %6630 = vmatprep.subr.mxu1 %v8520_v42 }
 0x239   :  { %6618 = vmatmul.mubr.msk.f32.vlgmr.msra.gmra.mrb[14].mxu0 %vm334_vm3, %v7288_v47  ;;  %v908_v2 = vpop.permute.xlu1 %907  ;;  %6623 = vmatmul.mubr.msk.f32.vlgmr.msra.gmra.mrb[12].mxu1 %vm334_vm3, %v7296_v50 }
 0x23a   :  { %6626 = vmatpush3.xpose.msk.msra.mxu0 %vm334_vm3, %v908_v2  ;;  %6627 = vmatprep.mubr.msk.f32.mxu0 %vm7134_vm2, %v8520_v42 }
 0x23b   :  { %6635 = vmatprep.subr.mxu0 %v8520_v42  ;;  %6632 = vmatprep.mubr.msk.f32.mxu1 %vm7134_vm2, %v8520_v42 }
 0x23d   :  { %6628 = vmatmul.mubr.msk.f32.vlgmr.msra.gmra.mrb[16].mxu0 %vm334_vm3, %v7294_v49 }
 0x23e   :  { %6637 = vmatprep.mubr.msk.f32.mxu0 %vm7134_vm2, %v8520_v42 }
 0x26f   :  { %v7467_v1 = vpop.xlane.xlu0 %339 }
 0x270   :  { %vm360_vm5 = vcmp.gt.f32.partialorder %v7467_v1, -1e+29 }
 0x273   :  { %v7471_v5 = vpop.xlane.xlu0 %345 }
 0x274   :  { %vm362_vm7 = vcmp.gt.f32.partialorder %v7471_v5, -1e+29 }
 0x277   :  { %v7475_v8 = vpop.xlane.xlu0 %351 }
 0x278   :  { %v7465_v0 = vpop.xlane.xlu1 %336  ;;  %vm364_vm9 = vcmp.gt.f32.partialorder %v7475_v8, -1e+29  ;;  %v5880_v8 = vld [vmem:[%s8513_s6] sm:$0xff] }
 0x279   :  { %vm359_vm4 = vcmp.gt.f32.partialorder %v7465_v0, -1e+29 }
 0x27c   :  { %v7469_v2 = vpop.xlane.xlu1 %342 }
 0x27d   :  { %vm361_vm6 = vcmp.gt.f32.partialorder %v7469_v2, -1e+29 }
 0x280   :  { %v7473_v6 = vpop.xlane.xlu1 %348 }
 0x281   :  { %vm363_vm8 = vcmp.gt.f32.partialorder %v7473_v6, -1e+29 }
 0x300   :  { %v440_v9 = vpop.f32.mrb[8].mxu0 }
 0x301   :  { %v983_v10 = vmul.f32 0.35355338, %v440_v9  ;;  %v6594_v11 = vpop.f32.mrb[9].mxu0  ;;  %v7477_v9 = vpop.xlane.xlu1 %354 }
 0x302   :  { %vm365_vm10 = vcmp.gt.f32.partialorder %v7477_v9, -1e+29  ;;  %v5881_v9 = vld [vmem:[%s8513_s6 + $0x8] sm:$0xff] }
 0x303   :  { %v7399_v12 = vadd.f32 %v983_v10, %v7318_v55 }
 0x304   :  { %v517_v13 = vpop.f32.mrb[10].mxu0  ;;  %v594_v14 = vpop.f32.mrb[8].mxu1 }
 0x305   :  { %v984_v15 = vmul.f32 0.35355338, %v517_v13  ;;  %v985_v16 = vmul.f32 0.35355338, %v594_v14  ;;  %v6599_v17 = vpop.f32.mrb[11].mxu0  ;;  %v6604_v18 = vpop.f32.mrb[9].mxu1 }
 0x306   :  { %v999_v19 = vsel %vm334_vm3, %v7399_v12, -inf }
 0x307   :  { %1000 = vmax.xlane.f32.xlu0 %v999_v19  ;;  %v7404_v20 = vadd.f32 %v984_v15, %v7304_v51  ;;  %v7407_v21 = vadd.f32 %v985_v16, %v7325_v57 }
 0x308   :  { %v671_v22 = vpop.f32.mrb[12].mxu0  ;;  %v748_v23 = vpop.f32.mrb[10].mxu1 }
 0x309   :  { %v986_v24 = vmul.f32 0.35355338, %v671_v22  ;;  %v987_v25 = vmul.f32 0.35355338, %v748_v23  ;;  %v6609_v26 = vpop.f32.mrb[13].mxu0  ;;  %v6614_v27 = vpop.f32.mrb[11].mxu1 }
 0x30a   :  { %v1002_v28 = vsel %vm334_vm3, %v7404_v20, -inf  ;;  %v1005_v29 = vsel %vm334_vm3, %v7407_v21, -inf }
 0x30b   :  { %1003 = vmax.xlane.f32.xlu1 %v1002_v28  ;;  %1006 = vmax.xlane.f32.xlu0 %v1005_v29  ;;  %v7414_v30 = vadd.f32 %v986_v24, %v7311_v53  ;;  %v7417_v31 = vadd.f32 %v987_v25, %v7380_v3 }
 0x30c   :  { %v825_v32 = vpop.f32.mrb[14].mxu0  ;;  %v902_v33 = vpop.f32.mrb[12].mxu1 }
 0x30d   :  { %v988_v34 = vmul.f32 0.35355338, %v825_v32  ;;  %v989_v35 = vmul.f32 0.35355338, %v902_v33  ;;  %v6619_v36 = vpop.f32.mrb[15].mxu0  ;;  %v6624_v37 = vpop.f32.mrb[13].mxu1 }
 0x30e   :  { %v1008_v38 = vsel %vm334_vm3, %v7414_v30, -inf  ;;  %v1011_v39 = vsel %vm334_vm3, %v7417_v31, -inf }
 0x30f   :  { %1009 = vmax.xlane.f32.xlu0 %v1008_v38  ;;  %1012 = vmax.xlane.f32.xlu1 %v1011_v39  ;;  %v7424_v40 = vadd.f32 %v988_v34, %v7385_v4  ;;  %v7427_v41 = vadd.f32 %v989_v35, %v7394_v7 }
 0x310   :  { %v979_v52 = vpop.f32.mrb[16].mxu0 }
 0x311   :  { %v990_v56 = vmul.f32 0.35355338, %v979_v52  ;;  %v6629_v58 = vpop.f32.mrb[17].mxu0  ;;  %v1014_v59 = vsel %vm334_vm3, %v7424_v40, -inf  ;;  %v1017_v60 = vsel %vm334_vm3, %v7427_v41, -inf }
 0x313   :  { %1015 = vmax.xlane.f32.xlu0 %v1014_v59  ;;  %1018 = vmax.xlane.f32.xlu1 %v1017_v60  ;;  %v7439_v61 = vadd.f32 %v990_v56, %v7432_v54 }
 0x315   :  { %v1020_v62 = vsel %vm334_vm3, %v7439_v61, -inf }
 0x317   :  { %1021 = vmax.xlane.f32.xlu0 %v1020_v62 }
 0x31b   :  { %357 = vmax.xlane.f32.xlu0 %v356_v63 }
 0x324   :  { %1111 = vrot.lane.b32.xlu1 %v7279_v44, %s7136_s21 }
 0x328   :  { %1263 = vrot.lane.b32.xlu1 %v7284_v46, %s7136_s21 }
 0x32c   :  { %1339 = vrot.lane.b32.xlu1 %v7282_v45, %s7136_s21 }
 0x330   :  { %1491 = vrot.lane.b32.xlu1 %v7288_v47, %s7136_s21 }
 0x331   :  { %1187 = vrot.lane.b32.xlu0 %v7277_v43, %s7136_s21 }
 0x334   :  { %1643 = vrot.lane.b32.xlu1 %v7294_v49, %s7136_s21 }
 0x335   :  { %1415 = vrot.lane.b32.xlu0 %v7290_v48, %s7136_s21 }
 0x338   :  { %1799 = vrot.lane.b32.xlu1 %v7277_v43, %s7137_s22 }
 0x339   :  { %1567 = vrot.lane.b32.xlu0 %v7296_v50, %s7136_s21 }
 0x33c   :  { %1797 = vrot.lane.b32.xlu1 %v7277_v43, %s7138_s23 }
 0x33d   :  { %1721 = vrot.lane.b32.xlu0 %v7279_v44, %s7137_s22 }
 0x340   :  { %1955 = vrot.lane.b32.xlu1 %v7282_v45, %s7137_s22 }
 0x341   :  { %1719 = vrot.lane.b32.xlu0 %v7279_v44, %s7138_s23 }
 0x345   :  { %1877 = vrot.lane.b32.xlu0 %v7284_v46, %s7137_s22 }
 0x394   :  { %v1001_v10 = vpop.xlane.xlu0 %1000 }
 0x395   :  { %v1023_v11 = vsub.f32 %v7399_v12, %v1001_v10 }
 0x397   :  { %v1031_v13 = vmul.f32 1.442695, %v1023_v11 }
 0x398   :  { %v1004_v14 = vpop.xlane.xlu1 %1003  ;;  %v1007_v15 = vpop.xlane.xlu0 %1006 }
 0x399   :  { %6997 = vpow2.f32 %v1031_v13  ;;  %v1024_v16 = vsub.f32 %v7404_v20, %v1004_v14  ;;  %v1025_v17 = vsub.f32 %v7407_v21, %v1007_v15 }
 0x39b   :  { %v1033_v18 = vmul.f32 1.442695, %v1024_v16  ;;  %v1035_v19 = vmul.f32 1.442695, %v1025_v17 }
 0x39c   :  { %v1010_v22 = vpop.xlane.xlu0 %1009  ;;  %v1013_v23 = vpop.xlane.xlu1 %1012 }
 0x39d   :  { %6999 = vpow2.f32 %v1033_v18  ;;  %v1026_v24 = vsub.f32 %v7414_v30, %v1010_v22  ;;  %v1027_v25 = vsub.f32 %v7417_v31, %v1013_v23 }
 0x39e   :  { %7001 = vpow2.f32 %v1035_v19 }
 0x39f   :  { %v1037_v26 = vmul.f32 1.442695, %v1026_v24  ;;  %v1039_v12 = vmul.f32 1.442695, %v1027_v25 }
 0x3a0   :  { %v1016_v27 = vpop.xlane.xlu0 %1015  ;;  %v1019_v28 = vpop.xlane.xlu1 %1018 }
 0x3a1   :  { %7003 = vpow2.f32 %v1037_v26  ;;  %v1028_v29 = vsub.f32 %v7424_v40, %v1016_v27  ;;  %v1029_v20 = vsub.f32 %v7427_v41, %v1019_v28 }
 0x3a2   :  { %7005 = vpow2.f32 %v1039_v12 }
 0x3a3   :  { %v7486_v21 = vpop.eup %6997  ;;  %v1041_v32 = vmul.f32 1.442695, %v1028_v29  ;;  %v1043_v33 = vmul.f32 1.442695, %v1029_v20 }
 0x3a4   :  { %v1022_v34 = vpop.xlane.xlu0 %1021  ;;  %v1112_v35 = vpop.permute.xlu1 %1111  ;;  %v1047_v30 = vsel %vm334_vm3, %v7486_v21, 0.0 }
 0x3a5   :  { %7007 = vpow2.f32 %v1041_v32  ;;  %v1030_v31 = vsub.f32 %v7439_v61, %v1022_v34  ;;  %1048 = vadd.xlane.f32.xlu1 %v1047_v30  ;;  %6631 = vmatpush3.msra.mxu1 %v1112_v35 }
 0x3a6   :  { %7009 = vpow2.f32 %v1043_v33  ;;  %6640 = vmatprep.subr.mxu1 %v8520_v42 }
 0x3a7   :  { %v7492_v36 = vpop.eup %6999  ;;  %v1045_v37 = vmul.f32 1.442695, %v1030_v31 }
 0x3a8   :  { %v7494_v38 = vpop.eup %7001  ;;  %v7496_v39 = vpop.xlane.xlu0 %357  ;;  %v1050_v40 = vsel %vm334_vm3, %v7492_v36, 0.0 }
 0x3a9   :  { %7011 = vpow2.f32 %v1045_v37  ;;  %1051 = vadd.xlane.f32.xlu0 %v1050_v40  ;;  %v1053_v41 = vsel %vm334_vm3, %v7494_v38, 0.0  ;;  %v1264_v14 = vpop.permute.xlu1 %1263  ;;  %vm366_vm11 = vcmp.gt.f32.partialorder %v7496_v39, -1e+29  ;;  %v5883_v39 = vld [vmem:[%s8513_s6 + $0x18] sm:$0xff] }
 0x3aa   :  { %1054 = vadd.xlane.f32.xlu1 %v1053_v41 }
 0x3ab   :  { %v7502_v52 = vpop.eup %7003 }
 0x3ac   :  { %v7504_v56 = vpop.eup %7005  ;;  %v1188_v58 = vpop.permute.xlu0 %1187  ;;  %v1056_v59 = vsel %vm334_vm3, %v7502_v52, 0.0 }
 0x3ad   :  { %1057 = vadd.xlane.f32.xlu0 %v1056_v59  ;;  %6636 = vmatpush3.msra.mxu0 %v1188_v58  ;;  %v1059_v60 = vsel %vm334_vm3, %v7504_v56, 0.0  ;;  %v1340_v15 = vpop.permute.xlu1 %1339 }
 0x3ae   :  { %1060 = vadd.xlane.f32.xlu1 %v1059_v60  ;;  %6645 = vmatprep.subr.mxu0 %v8520_v42 }
 0x3af   :  { %v7511_v61 = vpop.eup %7007 }
 0x3b0   :  { %v7513_v62 = vpop.eup %7009  ;;  %v1062_v63 = vsel %vm334_vm3, %v7511_v61, 0.0  ;;  %v1416_v17 = vpop.permute.xlu0 %1415 }
 0x3b1   :  { %1063 = vadd.xlane.f32.xlu0 %v1062_v63  ;;  %v1065_v10 = vsel %vm334_vm3, %v7513_v62, 0.0  ;;  %v7543_v16 = vpop.permute.xlu1 %1491 }
 0x3b2   :  { %1066 = vadd.xlane.f32.xlu1 %v1065_v10 }
 0x3b3   :  { %v7519_v11 = vpop.eup %7011 }
 0x3b4   :  { %v1068_v13 = vsel %vm334_vm3, %v7519_v11, 0.0  ;;  %v7547_v19 = vpop.permute.xlu0 %1567 }
 0x3b5   :  { %1069 = vadd.xlane.f32.xlu0 %v1068_v13  ;;  %v7545_v18 = vpop.permute.xlu1 %1643 }
 0x3b8   :  { %v7551_v23 = vpop.permute.xlu0 %1721 }
 0x3b9   :  { %v7549_v22 = vpop.permute.xlu1 %1799 }
 0x3bc   :  { %v7555_v25 = vpop.permute.xlu0 %1719 }
 0x3bd   :  { %v7553_v24 = vpop.permute.xlu1 %1797 }
 0x3c0   :  { %v7559_v12 = vpop.permute.xlu0 %1877 }
 0x3c1   :  { %v7557_v26 = vpop.permute.xlu1 %1955 }
 0x3c3   :  { %1953 = vrot.lane.b32.xlu1 %v7282_v45, %s7138_s23 }
 0x3c7   :  { %2111 = vrot.lane.b32.xlu1 %v7288_v47, %s7137_s22 }
 0x3cb   :  { %2109 = vrot.lane.b32.xlu1 %v7288_v47, %s7138_s23  ;;  %1875 = vrot.lane.b32.xlu0 %v7284_v46, %s7138_s23 }
 0x3cf   :  { %2267 = vrot.lane.b32.xlu1 %v7294_v49, %s7137_s22  ;;  %2033 = vrot.lane.b32.xlu0 %v7290_v48, %s7137_s22 }
 0x3d3   :  { %2265 = vrot.lane.b32.xlu1 %v7294_v49, %s7138_s23  ;;  %2031 = vrot.lane.b32.xlu0 %v7290_v48, %s7138_s23 }
 0x3d7   :  { %2189 = vrot.lane.b32.xlu0 %v7296_v50, %s7137_s22 }
 0x3db   :  { %2187 = vrot.lane.b32.xlu0 %v7296_v50, %s7138_s23  ;;  %s7146_s23 = smov 8  }
 0x432   :  { %v1049_v27 = vpop.xlane.xlu1 %1048 }
 0x433   :  { %7013 = vrcp.f32 %v1049_v27 }
 0x436   :  { %v1052_v28 = vpop.xlane.xlu0 %1051 }
 0x437   :  { %7015 = vrcp.f32 %v1052_v28  ;;  %v1055_v29 = vpop.xlane.xlu1 %1054 }
 0x438   :  { %7017 = vrcp.f32 %v1055_v29 }
 0x43a   :  { %v1058_v20 = vpop.xlane.xlu0 %1057 }
 0x43b   :  { %7019 = vrcp.f32 %v1058_v20  ;;  %v1061_v32 = vpop.xlane.xlu1 %1060 }
 0x43c   :  { %7021 = vrcp.f32 %v1061_v32 }
 0x43d   :  { %v7014_v33 = vpop.eup %7013 }
 0x43e   :  { %v1064_v34 = vpop.xlane.xlu0 %1063  ;;  %v1079_v35 = vmul.f32 %v7014_v33, %v7486_v21 }
 0x43f   :  { %7023 = vrcp.f32 %v1064_v34  ;;  %v1067_v30 = vpop.xlane.xlu1 %1066 }
 0x440   :  { %7025 = vrcp.f32 %v1067_v30  ;;  %v1103_v31 = vsel %vm359_vm4, %v1079_v35, 0.0 }
 0x441   :  { %v7016_v37 = vpop.eup %7015  ;;  %6633 = vmatmul.mubr.msk.f32.vlgmr.msra.gmra.mrb[14].mxu1 %vm334_vm3, %v1103_v31 }
 0x442   :  { %v7018_v40 = vpop.eup %7017  ;;  %6641 = vmatpush3.msra.mxu1 %v1264_v14  ;;  %v1070_v41 = vpop.xlane.xlu0 %1069  ;;  %6642 = vmatprep.mubr.msk.f32.mxu1 %vm7134_vm2, %v8520_v42  ;;  %v1080_v58 = vmul.f32 %v7016_v37, %v7492_v36 }
 0x443   :  { %7027 = vrcp.f32 %v1070_v41  ;;  %6650 = vmatprep.subr.mxu1 %v8520_v42  ;;  %v1081_v21 = vmul.f32 %v7018_v40, %v7494_v38  ;;  %v1954_v27 = vpop.permute.xlu1 %1953 }
 0x444   :  { %v1104_v59 = vsel %vm360_vm5, %v1080_v58, 0.0 }
 0x445   :  { %v7020_v60 = vpop.eup %7019  ;;  %6638 = vmatmul.mubr.msk.f32.vlgmr.msra.gmra.mrb[18].mxu0 %vm334_vm3, %v1104_v59  ;;  %v1105_v63 = vsel %vm361_vm6, %v1081_v21, 0.0 }
 0x446   :  { %v7022_v10 = vpop.eup %7021  ;;  %6643 = vmatmul.mubr.msk.f32.vlgmr.msra.gmra.mrb[16].mxu1 %vm334_vm3, %v1105_v63  ;;  %6646 = vmatpush3.msra.mxu0 %v1340_v15  ;;  %v1082_v36 = vmul.f32 %v7020_v60, %v7502_v52  ;;  %v1876_v13 = vpop.permute.xlu0 %1875 }
 0x447   :  { %6651 = vmatpush3.msra.mxu1 %v1416_v17  ;;  %6647 = vmatprep.mubr.msk.f32.mxu0 %vm7134_vm2, %v8520_v42  ;;  %v1083_v38 = vmul.f32 %v7022_v10, %v7504_v56  ;;  %v2112_v32 = vpop.permute.xlu1 %2111 }
 0x448   :  { %6652 = vmatprep.mubr.msk.f32.mxu1 %vm7134_vm2, %v8520_v42  ;;  %6655 = vmatprep.subr.mxu0 %v8520_v42  ;;  %v1106_v14 = vsel %vm362_vm7, %v1082_v36, 0.0 }
 0x449   :  { %v7024_v52 = vpop.eup %7023  ;;  %6660 = vmatprep.subr.mxu1 %v8520_v42  ;;  %6648 = vmatmul.mubr.msk.f32.vlgmr.msra.gmra.mrb[20].mxu0 %vm334_vm3, %v1106_v14  ;;  %v1107_v15 = vsel %vm363_vm8, %v1083_v38, 0.0 }
 0x44a   :  { %v7026_v56 = vpop.eup %7025  ;;  %6653 = vmatmul.mubr.msk.f32.vlgmr.msra.gmra.mrb[18].mxu1 %vm334_vm3, %v1107_v15  ;;  %6656 = vmatpush3.msra.mxu0 %v7543_v16  ;;  %v1084_v17 = vmul.f32 %v7024_v52, %v7511_v61  ;;  %v2034_v29 = vpop.permute.xlu0 %2033 }
 0x44b   :  { %6661 = vmatpush3.msra.mxu1 %v7547_v19  ;;  %6657 = vmatprep.mubr.msk.f32.mxu0 %vm7134_vm2, %v8520_v42  ;;  %v1085_v28 = vmul.f32 %v7026_v56, %v7513_v62 }
 0x44c   :  { %6662 = vmatprep.mubr.msk.f32.mxu1 %vm7134_vm2, %v8520_v42  ;;  %6665 = vmatprep.subr.mxu0 %v8520_v42  ;;  %v1108_v61 = vsel %vm364_vm9, %v1084_v17, 0.0 }
 0x44d   :  { %v7028_v16 = vpop.eup %7027  ;;  %6658 = vmatmul.mubr.msk.f32.vlgmr.msra.gmra.mrb[22].mxu0 %vm334_vm3, %v1108_v61  ;;  %v1109_v19 = vsel %vm365_vm10, %v1085_v28, 0.0  ;;  %6670 = vmatprep.subr.mxu1 %v8520_v42 }
 0x44e   :  { %6663 = vmatmul.mubr.msk.f32.vlgmr.msra.gmra.mrb[20].mxu1 %vm334_vm3, %v1109_v19  ;;  %6666 = vmatpush3.msra.mxu0 %v7545_v18  ;;  %v1086_v62 = vmul.f32 %v7028_v16, %v7519_v11  ;;  %v2032_v11 = vpop.permute.xlu0 %2031  ;;  %v2110_v18 = vpop.permute.xlu1 %2109 }
 0x44f   :  { %6667 = vmatprep.mubr.msk.f32.mxu0 %vm7134_vm2, %v8520_v42  ;;  %6672 = vmatprep.mubr.msk.f32.mxu1 %vm7134_vm2, %v8520_v42 }
 0x450   :  { %v1110_v20 = vsel %vm366_vm11, %v1086_v62, 0.0  ;;  %6675 = vmatprep.subr.mxu0 %v8520_v42 }
 0x451   :  { %6668 = vmatmul.mubr.msk.f32.vlgmr.msra.gmra.mrb[24].mxu0 %vm334_vm3, %v1110_v20 }
 0x452   :  { %6671 = vmatpush3.xpose.msk.msra.mxu1 %vm334_vm3, %v7551_v23  ;;  %6677 = vmatprep.mubr.msk.f32.mxu0 %vm7134_vm2, %v8520_v42  ;;  %v2268_v23 = vpop.permute.xlu1 %2267 }
 0x453   :  { %6680 = vmatprep.subr.mxu1 %v8520_v42 }
 0x455   :  { %6673 = vmatmul.mubr.msk.f32.vlgmr.msra.gmra.mrb[22].mxu1 %vm334_vm3, %v7555_v25  ;;  %6676 = vmatpush3.xpose.msk.msra.mxu0 %vm334_vm3, %v7549_v22  ;;  %v2190_v22 = vpop.permute.xlu0 %2189 }
 0x456   :  { %6681 = vmatpush3.xpose.msk.msra.mxu1 %vm334_vm3, %v7559_v12  ;;  %6682 = vmatprep.mubr.msk.f32.mxu1 %vm7134_vm2, %v8520_v42  ;;  %v2266_v25 = vpop.permute.xlu1 %2265 }
 0x457   :  { %6685 = vmatprep.subr.mxu0 %v8520_v42  ;;  %6690 = vmatprep.subr.mxu1 %v8520_v42 }
 0x458   :  { %6678 = vmatmul.mubr.msk.f32.vlgmr.msra.gmra.mrb[26].mxu0 %vm334_vm3, %v7553_v24 }
 0x459   :  { %6683 = vmatmul.mubr.msk.f32.vlgmr.msra.gmra.mrb[24].mxu1 %vm334_vm3, %v1876_v13  ;;  %6686 = vmatpush3.xpose.msk.msra.mxu0 %vm334_vm3, %v7557_v26  ;;  %v2188_v24 = vpop.permute.xlu0 %2187 }
 0x45a   :  { %6691 = vmatpush3.xpose.msk.msra.mxu1 %vm334_vm3, %v2034_v29  ;;  %6687 = vmatprep.mubr.msk.f32.mxu0 %vm7134_vm2, %v8520_v42 }
 0x45b   :  { %6692 = vmatprep.mubr.msk.f32.mxu1 %vm7134_vm2, %v8520_v42  ;;  %6695 = vmatprep.subr.mxu0 %v8520_v42 }
 0x45c   :  { %6688 = vmatmul.mubr.msk.f32.vlgmr.msra.gmra.mrb[28].mxu0 %vm334_vm3, %v1954_v27  ;;  %6700 = vmatprep.subr.mxu1 %v8520_v42 }
 0x45d   :  { %6693 = vmatmul.mubr.msk.f32.vlgmr.msra.gmra.mrb[26].mxu1 %vm334_vm3, %v2032_v11  ;;  %6696 = vmatpush3.xpose.msk.msra.mxu0 %vm334_vm3, %v2112_v32 }
 0x45e   :  { %6701 = vmatpush3.xpose.msk.msra.mxu1 %vm334_vm3, %v2190_v22  ;;  %6697 = vmatprep.mubr.msk.f32.mxu0 %vm7134_vm2, %v8520_v42 }
 0x45f   :  { %6702 = vmatprep.mubr.msk.f32.mxu1 %vm7134_vm2, %v8520_v42  ;;  %6705 = vmatprep.subr.mxu0 %v8520_v42 }
 0x460   :  { %6698 = vmatmul.mubr.msk.f32.vlgmr.msra.gmra.mrb[30].mxu0 %vm334_vm3, %v2110_v18  ;;  %6710 = vmatprep.subr.mxu1 %v8520_v42 }
 0x461   :  { %6703 = vmatmul.mubr.msk.f32.vlgmr.msra.gmra.mrb[28].mxu1 %vm334_vm3, %v2188_v24  ;;  %6706 = vmatpush3.xpose.msk.msra.mxu0 %vm334_vm3, %v2268_v23 }
 0x462   :  { %6707 = vmatprep.mubr.msk.f32.mxu0 %vm7134_vm2, %v8520_v42  ;;  %6715 = vmatprep.subr.mxu0 %v8520_v42 }
 0x463   :  { %6712 = vmatprep.mubr.msk.f32.mxu1 %vm7134_vm2, %v8520_v42 }
 0x464   :  { %6708 = vmatmul.mubr.msk.f32.vlgmr.msra.gmra.mrb[32].mxu0 %vm334_vm3, %v2266_v25 }
 0x465   :  { %6717 = vmatprep.mubr.msk.f32.mxu0 %vm7134_vm2, %v8520_v42 }
 0x514   :  { %v7672_v26 = vpop.f32.mrb[14].mxu1 }
 0x515   :  { %8522 = vst [vmem:[#allocation2_spill] sm:$0xff] %v7672_v26  ;;  %v6634_v12 = vpop.f32.mrb[15].mxu1 }
 0x518   :  { %v7674_v33 = vpop.f32.mrb[18].mxu0 }
 0x519   :  { %8523 = vst [vmem:[#allocation3_spill] sm:$0xff] %v7674_v33  ;;  %v7676_v34 = vpop.f32.mrb[16].mxu1  ;;  %v6639_v35 = vpop.f32.mrb[19].mxu0 }
 0x51a   :  { %8524 = vst [vmem:[#allocation4_spill] sm:$0xff] %v7676_v34  ;;  %v6644_v30 = vpop.f32.mrb[17].mxu1 }
 0x51c   :  { %v7678_v31 = vpop.f32.mrb[20].mxu0 }
 0x51d   :  { %8525 = vst [vmem:[#allocation5_spill] sm:$0xff] %v7678_v31  ;;  %v7680_v37 = vpop.f32.mrb[18].mxu1  ;;  %v6649_v40 = vpop.f32.mrb[21].mxu0 }
 0x51e   :  { %8526 = vst [vmem:[#allocation6_spill] sm:$0xff] %v7680_v37  ;;  %v6654_v41 = vpop.f32.mrb[19].mxu1 }
 0x520   :  { %v7682_v58 = vpop.f32.mrb[22].mxu0 }
 0x521   :  { %8527 = vst [vmem:[#allocation7_spill] sm:$0xff] %v7682_v58  ;;  %v7684_v21 = vpop.f32.mrb[20].mxu1  ;;  %v6659_v59 = vpop.f32.mrb[23].mxu0 }
 0x522   :  { %8528 = vst [vmem:[#allocation8_spill] sm:$0xff] %v7684_v21  ;;  %v6664_v60 = vpop.f32.mrb[21].mxu1 }
 0x524   :  { %v7686_v63 = vpop.f32.mrb[24].mxu0 }
 0x525   :  { %8529 = vst [vmem:[#allocation9_spill] sm:$0xff] %v7686_v63  ;;  %v6669_v10 = vpop.f32.mrb[25].mxu0 }
 0x528   :  { %v1793_v36 = vpop.f32.mrb[22].mxu1 }
 0x529   :  { %v2343_v38 = vmul.f32 0.35355338, %v1793_v36  ;;  %v6674_v13 = vpop.f32.mrb[23].mxu1 }
 0x52b   :  { %v1871_v14 = vpop.f32.mrb[26].mxu0  ;;  %v7689_v52 = vadd.f32 %v2343_v38, %v7318_v55 }
 0x52c   :  { %v2344_v15 = vmul.f32 0.35355338, %v1871_v14  ;;  %v1949_v56 = vpop.f32.mrb[24].mxu1  ;;  %v6679_v17 = vpop.f32.mrb[27].mxu0 }
 0x52d   :  { %v2345_v27 = vmul.f32 0.35355338, %v1949_v56  ;;  %v6684_v28 = vpop.f32.mrb[25].mxu1  ;;  %v2359_v61 = vsel %vm334_vm3, %v7689_v52, -inf }
 0x52e   :  { %2360 = vmax.xlane.f32.xlu0 %v2359_v61  ;;  %v2352_v16 = vadd.f32 %v2344_v15, %v7304_v51 }
 0x52f   :  { %v2027_v19 = vpop.f32.mrb[28].mxu0  ;;  %v2353_v29 = vadd.f32 %v2345_v27, %v7325_v57 }
 0x530   :  { %v2346_v62 = vmul.f32 0.35355338, %v2027_v19  ;;  %v2105_v20 = vpop.f32.mrb[26].mxu1  ;;  %v6689_v32 = vpop.f32.mrb[29].mxu0  ;;  %v2362_v55 = vsel %vm334_vm3, %v2352_v16, -inf }
 0x531   :  { %v2347_v11 = vmul.f32 0.35355338, %v2105_v20  ;;  %v6694_v18 = vpop.f32.mrb[27].mxu1  ;;  %2363 = vmax.xlane.f32.xlu1 %v2362_v55  ;;  %v2365_v22 = vsel %vm334_vm3, %v2353_v29, -inf }
 0x532   :  { %2366 = vmax.xlane.f32.xlu0 %v2365_v22  ;;  %v2354_v23 = vadd.f32 %v2346_v62, %v7311_v53 }
 0x533   :  { %v2183_v24 = vpop.f32.mrb[30].mxu0  ;;  %v2355_v25 = vadd.f32 %v2347_v11, %v7380_v3 }
 0x534   :  { %v2348_v51 = vmul.f32 0.35355338, %v2183_v24  ;;  %v2261_v12 = vpop.f32.mrb[28].mxu1  ;;  %v6699_v35 = vpop.f32.mrb[31].mxu0  ;;  %v2368_v57 = vsel %vm334_vm3, %v2354_v23, -inf }
 0x535   :  { %v2349_v30 = vmul.f32 0.35355338, %v2261_v12  ;;  %v6704_v40 = vpop.f32.mrb[29].mxu1  ;;  %v2371_v41 = vsel %vm334_vm3, %v2355_v25, -inf }
 0x536   :  { %2369 = vmax.xlane.f32.xlu0 %v2368_v57  ;;  %2372 = vmax.xlane.f32.xlu1 %v2371_v41  ;;  %v2356_v59 = vadd.f32 %v2348_v51, %v7385_v4 }
 0x537   :  { %v2339_v60 = vpop.f32.mrb[32].mxu0  ;;  %v2357_v10 = vadd.f32 %v2349_v30, %v7394_v7 }
 0x538   :  { %v2350_v53 = vmul.f32 0.35355338, %v2339_v60  ;;  %v6709_v36 = vpop.f32.mrb[33].mxu0  ;;  %v2374_v3 = vsel %vm334_vm3, %v2356_v59, -inf }
 0x539   :  { %v2377_v38 = vsel %vm334_vm3, %v2357_v10, -inf }
 0x53a   :  { %2375 = vmax.xlane.f32.xlu0 %v2374_v3  ;;  %2378 = vmax.xlane.f32.xlu1 %v2377_v38  ;;  %v2358_v13 = vadd.f32 %v2350_v53, %v7432_v54 }
 0x53c   :  { %v2380_v14 = vsel %vm334_vm3, %v2358_v13, -inf }
 0x53e   :  { %2381 = vmax.xlane.f32.xlu0 %v2380_v14 }
 0x54b   :  { %2455 = vrot.lane.b32.xlu1 %v7279_v44, %s7139_s24 }
 0x54f   :  { %2607 = vrot.lane.b32.xlu1 %v7284_v46, %s7139_s24 }
 0x553   :  { %2683 = vrot.lane.b32.xlu1 %v7282_v45, %s7139_s24 }
 0x554   :  { %2531 = vrot.lane.b32.xlu0 %v7277_v43, %s7139_s24 }
 0x557   :  { %2835 = vrot.lane.b32.xlu1 %v7288_v47, %s7139_s24 }
 0x558   :  { %2759 = vrot.lane.b32.xlu0 %v7290_v48, %s7139_s24 }
 0x55b   :  { %2987 = vrot.lane.b32.xlu1 %v7294_v49, %s7139_s24 }
 0x55c   :  { %2911 = vrot.lane.b32.xlu0 %v7296_v50, %s7139_s24  ;;  %s7147_s24 = smov 16  }
 0x55f   :  { %3143 = vrot.lane.b32.xlu1 %v7277_v43, %s7140_s25 }
 0x560   :  { %3065 = vrot.lane.b32.xlu0 %v7279_v44, %s7140_s25 }
 0x563   :  { %3141 = vrot.lane.b32.xlu1 %v7277_v43, %s7141_s26 }
 0x564   :  { %3063 = vrot.lane.b32.xlu0 %v7279_v44, %s7141_s26 }
 0x567   :  { %3299 = vrot.lane.b32.xlu1 %v7282_v45, %s7140_s25 }
 0x568   :  { %3221 = vrot.lane.b32.xlu0 %v7284_v46, %s7140_s25 }
 0x5bb   :  { %v2361_v4 = vpop.xlane.xlu0 %2360 }
 0x5bc   :  { %v2383_v7 = vsub.f32 %v7689_v52, %v2361_v4 }
 0x5be   :  { %v2391_v54 = vmul.f32 1.442695, %v2383_v7  ;;  %v2364_v15 = vpop.xlane.xlu1 %2363 }
 0x5bf   :  { %v2384_v56 = vsub.f32 %v2352_v16, %v2364_v15  ;;  %v2367_v17 = vpop.xlane.xlu0 %2366 }
 0x5c0   :  { %7029 = vpow2.f32 %v2391_v54  ;;  %v2385_v27 = vsub.f32 %v2353_v29, %v2367_v17 }
 0x5c1   :  { %v2393_v28 = vmul.f32 1.442695, %v2384_v56 }
 0x5c2   :  { %v2395_v61 = vmul.f32 1.442695, %v2385_v27 }
 0x5c3   :  { %7031 = vpow2.f32 %v2393_v28  ;;  %v2370_v19 = vpop.xlane.xlu0 %2369  ;;  %v2373_v62 = vpop.xlane.xlu1 %2372 }
 0x5c4   :  { %7033 = vpow2.f32 %v2395_v61  ;;  %v2386_v20 = vsub.f32 %v2354_v23, %v2370_v19  ;;  %v2387_v32 = vsub.f32 %v2355_v25, %v2373_v62 }
 0x5c6   :  { %v2397_v55 = vmul.f32 1.442695, %v2386_v20  ;;  %v2399_v11 = vmul.f32 1.442695, %v2387_v32 }
 0x5c7   :  { %v2376_v18 = vpop.xlane.xlu0 %2375  ;;  %v2379_v22 = vpop.xlane.xlu1 %2378 }
 0x5c8   :  { %7035 = vpow2.f32 %v2397_v55  ;;  %v2388_v52 = vsub.f32 %v2356_v59, %v2376_v18  ;;  %v2389_v24 = vsub.f32 %v2357_v10, %v2379_v22 }
 0x5c9   :  { %7037 = vpow2.f32 %v2399_v11 }
 0x5ca   :  { %v7728_v16 = vpop.eup %7029  ;;  %v2401_v51 = vmul.f32 1.442695, %v2388_v52  ;;  %v2403_v29 = vmul.f32 1.442695, %v2389_v24 }
 0x5cb   :  { %v2382_v12 = vpop.xlane.xlu0 %2381  ;;  %v2456_v35 = vpop.permute.xlu1 %2455  ;;  %v2407_v57 = vsel %vm334_vm3, %v7728_v16, 0.0 }
 0x5cc   :  { %7039 = vpow2.f32 %v2401_v51  ;;  %v2390_v23 = vsub.f32 %v2358_v13, %v2382_v12  ;;  %2408 = vadd.xlane.f32.xlu1 %v2407_v57  ;;  %6711 = vmatpush3.msra.mxu1 %v2456_v35 }
 0x5cd   :  { %v7732_v25 = vpop.eup %7031  ;;  %7041 = vpow2.f32 %v2403_v29  ;;  %6720 = vmatprep.subr.mxu1 %v8520_v42 }
 0x5ce   :  { %v7735_v30 = vpop.eup %7033  ;;  %v2405_v40 = vmul.f32 1.442695, %v2390_v23  ;;  %v2410_v41 = vsel %vm334_vm3, %v7732_v25, 0.0 }
 0x5cf   :  { %v2532_v59 = vpop.permute.xlu0 %2531  ;;  %2411 = vadd.xlane.f32.xlu0 %v2410_v41  ;;  %v2413_v60 = vsel %vm334_vm3, %v7735_v30, 0.0  ;;  %v2608_v15 = vpop.permute.xlu1 %2607 }
 0x5d0   :  { %7043 = vpow2.f32 %v2405_v40  ;;  %6716 = vmatpush3.msra.mxu0 %v2532_v59  ;;  %2414 = vadd.xlane.f32.xlu1 %v2413_v60 }
 0x5d1   :  { %6725 = vmatprep.subr.mxu0 %v8520_v42 }
 0x5d2   :  { %v7742_v10 = vpop.eup %7035 }
 0x5d3   :  { %v7744_v53 = vpop.eup %7037  ;;  %v2416_v36 = vsel %vm334_vm3, %v7742_v10, 0.0  ;;  %v2684_v56 = vpop.permute.xlu1 %2683 }
 0x5d4   :  { %2417 = vadd.xlane.f32.xlu0 %v2416_v36  ;;  %v2419_v3 = vsel %vm334_vm3, %v7744_v53, 0.0  ;;  %v2760_v27 = vpop.permute.xlu0 %2759 }
 0x5d5   :  { %2420 = vadd.xlane.f32.xlu1 %v2419_v3 }
 0x5d6   :  { %v7750_v38 = vpop.eup %7039 }
 0x5d7   :  { %v7752_v13 = vpop.eup %7041  ;;  %v2422_v14 = vsel %vm334_vm3, %v7750_v38, 0.0  ;;  %v2836_v17 = vpop.permute.xlu1 %2835 }
 0x5d8   :  { %2423 = vadd.xlane.f32.xlu0 %v2422_v14  ;;  %v2425_v4 = vsel %vm334_vm3, %v7752_v13, 0.0  ;;  %v2912_v61 = vpop.permute.xlu0 %2911 }
 0x5d9   :  { %2426 = vadd.xlane.f32.xlu1 %v2425_v4 }
 0x5da   :  { %v7758_v7 = vpop.eup %7043 }
 0x5db   :  { %v2428_v54 = vsel %vm334_vm3, %v7758_v7, 0.0  ;;  %v7798_v28 = vpop.permute.xlu1 %2987 }
 0x5dc   :  { %2429 = vadd.xlane.f32.xlu0 %v2428_v54  ;;  %v7802_v62 = vpop.permute.xlu0 %3065 }
 0x5df   :  { %v7800_v19 = vpop.permute.xlu1 %3143 }
 0x5e0   :  { %v7806_v32 = vpop.permute.xlu0 %3063 }
 0x5e3   :  { %v7804_v20 = vpop.permute.xlu1 %3141 }
 0x5e4   :  { %v7810_v11 = vpop.permute.xlu0 %3221 }
 0x5e7   :  { %v7808_v55 = vpop.permute.xlu1 %3299 }
 0x5ea   :  { %3297 = vrot.lane.b32.xlu1 %v7282_v45, %s7141_s26 }
 0x5ee   :  { %3455 = vrot.lane.b32.xlu1 %v7288_v47, %s7140_s25 }
 0x5f2   :  { %3453 = vrot.lane.b32.xlu1 %v7288_v47, %s7141_s26  ;;  %3219 = vrot.lane.b32.xlu0 %v7284_v46, %s7141_s26 }
 0x5f6   :  { %3611 = vrot.lane.b32.xlu1 %v7294_v49, %s7140_s25  ;;  %3377 = vrot.lane.b32.xlu0 %v7290_v48, %s7140_s25 }
 0x5fa   :  { %3609 = vrot.lane.b32.xlu1 %v7294_v49, %s7141_s26  ;;  %3375 = vrot.lane.b32.xlu0 %v7290_v48, %s7141_s26 }
 0x5fe   :  { %3799 = vrot.lane.b32.xlu1 %v7279_v44, %s7142_s0  ;;  %3533 = vrot.lane.b32.xlu0 %v7296_v50, %s7140_s25 }
 0x602   :  { %3951 = vrot.lane.b32.xlu1 %v7284_v46, %s7142_s0  ;;  %3531 = vrot.lane.b32.xlu0 %v7296_v50, %s7141_s26 }
 0x606   :  { %4027 = vrot.lane.b32.xlu1 %v7282_v45, %s7142_s0  ;;  %3875 = vrot.lane.b32.xlu0 %v7277_v43, %s7142_s0 }
 0x60a   :  { %4179 = vrot.lane.b32.xlu1 %v7288_v47, %s7142_s0  ;;  %4103 = vrot.lane.b32.xlu0 %v7290_v48, %s7142_s0 }
 0x60e   :  { %4331 = vrot.lane.b32.xlu1 %v7294_v49, %s7142_s0  ;;  %4255 = vrot.lane.b32.xlu0 %v7296_v50, %s7142_s0 }
 0x612   :  { %4487 = vrot.lane.b32.xlu1 %v7277_v43, %s7143_s4  ;;  %4409 = vrot.lane.b32.xlu0 %v7279_v44, %s7143_s4 }
 0x616   :  { %4485 = vrot.lane.b32.xlu1 %v7277_v43, %s7144_s5  ;;  %4407 = vrot.lane.b32.xlu0 %v7279_v44, %s7144_s5 }
 0x659   :  { %v2409_v18 = vpop.xlane.xlu1 %2408 }
 0x65a   :  { %7045 = vrcp.f32 %v2409_v18 }
 0x65c   :  { %v2412_v22 = vpop.xlane.xlu0 %2411 }
 0x65d   :  { %7047 = vrcp.f32 %v2412_v22  ;;  %v2415_v52 = vpop.xlane.xlu1 %2414 }
 0x65e   :  { %7049 = vrcp.f32 %v2415_v52 }
 0x661   :  { %v2418_v24 = vpop.xlane.xlu0 %2417 }
 0x662   :  { %7051 = vrcp.f32 %v2418_v24  ;;  %v2421_v51 = vpop.xlane.xlu1 %2420 }
 0x663   :  { %7053 = vrcp.f32 %v2421_v51 }
 0x664   :  { %v7046_v29 = vpop.eup %7045 }
 0x665   :  { %v2424_v12 = vpop.xlane.xlu0 %2423  ;;  %v2439_v35 = vmul.f32 %v7046_v29, %v7728_v16 }
 0x666   :  { %7055 = vrcp.f32 %v2424_v12  ;;  %v2427_v57 = vpop.xlane.xlu1 %2426 }
 0x667   :  { %v7048_v23 = vpop.eup %7047  ;;  %7057 = vrcp.f32 %v2427_v57  ;;  %v2447_v40 = vsel %vm359_vm4, %v2439_v35, 0.0 }
 0x668   :  { %v7050_v41 = vpop.eup %7049  ;;  %6713 = vmatmul.mubr.msk.f32.vlgmr.msra.gmra.mrb[30].mxu1 %vm334_vm3, %v2447_v40  ;;  %v2440_v59 = vmul.f32 %v7048_v23, %v7732_v25 }
 0x669   :  { %6721 = vmatpush3.msra.mxu1 %v2608_v15  ;;  %v2430_v60 = vpop.xlane.xlu0 %2429  ;;  %6722 = vmatprep.mubr.msk.f32.mxu1 %vm7134_vm2, %v8520_v42  ;;  %v2441_v36 = vmul.f32 %v7050_v41, %v7735_v30 }
 0x66a   :  { %7059 = vrcp.f32 %v2430_v60  ;;  %v7820_v16 = vpop.permute.xlu1 %3297  ;;  %6730 = vmatprep.subr.mxu1 %v8520_v42  ;;  %v2448_v3 = vsel %vm360_vm5, %v2440_v59, 0.0 }
 0x66b   :  { %6718 = vmatmul.mubr.msk.f32.vlgmr.msra.gmra.mrb[34].mxu0 %vm334_vm3, %v2448_v3  ;;  %v2449_v25 = vsel %vm361_vm6, %v2441_v36, 0.0 }
 0x66c   :  { %v7052_v14 = vpop.eup %7051  ;;  %6723 = vmatmul.mubr.msk.f32.vlgmr.msra.gmra.mrb[32].mxu1 %vm334_vm3, %v2449_v25  ;;  %6726 = vmatpush3.msra.mxu0 %v2684_v56 }
 0x66d   :  { %v7054_v4 = vpop.eup %7053  ;;  %6731 = vmatpush3.msra.mxu1 %v2760_v27  ;;  %v3220_v30 = vpop.permute.xlu0 %3219  ;;  %6727 = vmatprep.mubr.msk.f32.mxu0 %vm7134_vm2, %v8520_v42  ;;  %v2442_v54 = vmul.f32 %v7052_v14, %v7742_v10 }
 0x66e   :  { %6732 = vmatprep.mubr.msk.f32.mxu1 %vm7134_vm2, %v8520_v42  ;;  %6735 = vmatprep.subr.mxu0 %v8520_v42  ;;  %v2443_v15 = vmul.f32 %v7054_v4, %v7744_v53  ;;  %v3456_v27 = vpop.permute.xlu1 %3455 }
 0x66f   :  { %6740 = vmatprep.subr.mxu1 %v8520_v42  ;;  %v2450_v56 = vsel %vm362_vm7, %v2442_v54, 0.0 }
 0x670   :  { %v7056_v18 = vpop.eup %7055  ;;  %6728 = vmatmul.mubr.msk.f32.vlgmr.msra.gmra.mrb[36].mxu0 %vm334_vm3, %v2450_v56  ;;  %v2451_v22 = vsel %vm363_vm8, %v2443_v15, 0.0 }
 0x671   :  { %v7058_v10 = vpop.eup %7057  ;;  %6733 = vmatmul.mubr.msk.f32.vlgmr.msra.gmra.mrb[34].mxu1 %vm334_vm3, %v2451_v22  ;;  %6736 = vmatpush3.msra.mxu0 %v2836_v17  ;;  %v2444_v52 = vmul.f32 %v7056_v18, %v7750_v38  ;;  %v3378_v24 = vpop.permute.xlu0 %3377  ;;  %v7937_v18 = vld [vmem:[%s8512_s1] sm:$0xff] }
 0x672   :  { %6741 = vmatpush3.msra.mxu1 %v2912_v61  ;;  %6737 = vmatprep.mubr.msk.f32.mxu0 %vm7134_vm2, %v8520_v42  ;;  %v2445_v53 = vmul.f32 %v7058_v10, %v7752_v13  ;;  %v3454_v17 = vpop.permute.xlu1 %3453 }
 0x673   :  { %6742 = vmatprep.mubr.msk.f32.mxu1 %vm7134_vm2, %v8520_v42  ;;  %6745 = vmatprep.subr.mxu0 %v8520_v42  ;;  %v2452_v51 = vsel %vm364_vm9, %v2444_v52, 0.0 }
 0x674   :  { %v7060_v29 = vpop.eup %7059  ;;  %6738 = vmatmul.mubr.msk.f32.vlgmr.msra.gmra.mrb[38].mxu0 %vm334_vm3, %v2452_v51  ;;  %v2453_v38 = vsel %vm365_vm10, %v2445_v53, 0.0  ;;  %6750 = vmatprep.subr.mxu1 %v8520_v42 }
 0x675   :  { %6743 = vmatmul.mubr.msk.f32.vlgmr.msra.gmra.mrb[36].mxu1 %vm334_vm3, %v2453_v38  ;;  %6746 = vmatpush3.msra.mxu0 %v7798_v28  ;;  %v2446_v13 = vmul.f32 %v7060_v29, %v7758_v7  ;;  %v3376_v12 = vpop.permute.xlu0 %3375  ;;  %v7947_v38 = vld [vmem:[%s8512_s1 + $0x8] sm:$0xff] }
 0x676   :  { %6747 = vmatprep.mubr.msk.f32.mxu0 %vm7134_vm2, %v8520_v42  ;;  %6752 = vmatprep.mubr.msk.f32.mxu1 %vm7134_vm2, %v8520_v42  ;;  %v3612_v7 = vpop.permute.xlu1 %3611 }
 0x677   :  { %v2454_v61 = vsel %vm366_vm11, %v2446_v13, 0.0  ;;  %6755 = vmatprep.subr.mxu0 %v8520_v42 }
 0x678   :  { %6748 = vmatmul.mubr.msk.f32.vlgmr.msra.gmra.mrb[40].mxu0 %vm334_vm3, %v2454_v61 }
 0x679   :  { %6751 = vmatpush3.xpose.msk.msra.mxu1 %vm334_vm3, %v7802_v62  ;;  %6757 = vmatprep.mubr.msk.f32.mxu0 %vm7134_vm2, %v8520_v42  ;;  %v3534_v28 = vpop.permute.xlu0 %3533 }
 0x67a   :  { %6760 = vmatprep.subr.mxu1 %v8520_v42 }
 0x67c   :  { %6753 = vmatmul.mubr.msk.f32.vlgmr.msra.gmra.mrb[38].mxu1 %vm334_vm3, %v7806_v32  ;;  %6756 = vmatpush3.xpose.msk.msra.mxu0 %vm334_vm3, %v7800_v19  ;;  %v3610_v19 = vpop.permute.xlu1 %3609 }
 0x67d   :  { %6761 = vmatpush3.xpose.msk.msra.mxu1 %vm334_vm3, %v7810_v11  ;;  %6762 = vmatprep.mubr.msk.f32.mxu1 %vm7134_vm2, %v8520_v42  ;;  %v3532_v62 = vpop.permute.xlu0 %3531 }
 0x67e   :  { %6765 = vmatprep.subr.mxu0 %v8520_v42  ;;  %6770 = vmatprep.subr.mxu1 %v8520_v42 }
 0x67f   :  { %6758 = vmatmul.mubr.msk.f32.vlgmr.msra.gmra.mrb[42].mxu0 %vm334_vm3, %v7804_v20 }
 0x680   :  { %6763 = vmatmul.mubr.msk.f32.vlgmr.msra.gmra.mrb[40].mxu1 %vm334_vm3, %v3220_v30  ;;  %6766 = vmatpush3.xpose.msk.msra.mxu0 %vm334_vm3, %v7808_v55  ;;  %v3800_v20 = vpop.permute.xlu1 %3799 }
 0x681   :  { %6771 = vmatpush3.xpose.msk.msra.mxu1 %vm334_vm3, %v3378_v24  ;;  %6767 = vmatprep.mubr.msk.f32.mxu0 %vm7134_vm2, %v8520_v42  ;;  %v3876_v32 = vpop.permute.xlu0 %3875 }
 0x682   :  { %6772 = vmatprep.mubr.msk.f32.mxu1 %vm7134_vm2, %v8520_v42  ;;  %6775 = vmatprep.subr.mxu0 %v8520_v42 }
 0x683   :  { %6768 = vmatmul.mubr.msk.f32.vlgmr.msra.gmra.mrb[44].mxu0 %vm334_vm3, %v7820_v16  ;;  %6780 = vmatprep.subr.mxu1 %v8520_v42 }
 0x684   :  { %6773 = vmatmul.mubr.msk.f32.vlgmr.msra.gmra.mrb[42].mxu1 %vm334_vm3, %v3376_v12  ;;  %6776 = vmatpush3.xpose.msk.msra.mxu0 %vm334_vm3, %v3456_v27 }
 0x685   :  { %6781 = vmatpush3.xpose.msk.msra.mxu1 %vm334_vm3, %v3534_v28  ;;  %6777 = vmatprep.mubr.msk.f32.mxu0 %vm7134_vm2, %v8520_v42 }
 0x686   :  { %6782 = vmatprep.mubr.msk.f32.mxu1 %vm7134_vm2, %v8520_v42  ;;  %6785 = vmatprep.subr.mxu0 %v8520_v42 }
 0x687   :  { %6778 = vmatmul.mubr.msk.f32.vlgmr.msra.gmra.mrb[46].mxu0 %vm334_vm3, %v3454_v17  ;;  %6790 = vmatprep.subr.mxu1 %v8520_v42  ;;  %v7955_v17 = vld [vmem:[%s8512_s1 + $0x10] sm:$0xff] }
 0x688   :  { %6783 = vmatmul.mubr.msk.f32.vlgmr.msra.gmra.mrb[44].mxu1 %vm334_vm3, %v3532_v62  ;;  %6786 = vmatpush3.xpose.msk.msra.mxu0 %vm334_vm3, %v3612_v7 }
 0x689   :  { %6791 = vmatpush3.msra.mxu1 %v3800_v20  ;;  %6787 = vmatprep.mubr.msk.f32.mxu0 %vm7134_vm2, %v8520_v42 }
 0x68a   :  { %6795 = vmatprep.subr.mxu0 %v8520_v42  ;;  %6792 = vmatprep.mubr.msk.f32.mxu1 %vm7134_vm2, %v8520_v42 }
 0x68b   :  { %6788 = vmatmul.mubr.msk.f32.vlgmr.msra.gmra.mrb[48].mxu0 %vm334_vm3, %v3610_v19  ;;  %6800 = vmatprep.subr.mxu1 %v8520_v42 }
 0x68c   :  { %6796 = vmatpush3.msra.mxu0 %v3876_v32  ;;  %6797 = vmatprep.mubr.msk.f32.mxu0 %vm7134_vm2, %v8520_v42 }
 0x68d   :  { %6805 = vmatprep.subr.mxu0 %v8520_v42 }
 0x73b   :  { %v7918_v55 = vpop.f32.mrb[30].mxu1 }
 0x73c   :  { %v6714_v11 = vpop.f32.mrb[31].mxu1 }
 0x73e   :  { %v7920_v35 = vpop.f32.mrb[34].mxu0 }
 0x73f   :  { %v7922_v57 = vpop.f32.mrb[32].mxu1  ;;  %v6719_v23 = vpop.f32.mrb[35].mxu0 }
 0x740   :  { %v6724_v40 = vpop.f32.mrb[33].mxu1  ;;  %v7964_v23 = vld [vmem:[%s8512_s1 + $0x18] sm:$0xff] }
 0x743   :  { %v7924_v41 = vpop.f32.mrb[36].mxu0 }
 0x744   :  { %v7926_v59 = vpop.f32.mrb[34].mxu1  ;;  %v6729_v60 = vpop.f32.mrb[37].mxu0 }
 0x745   :  { %8530 = vst [vmem:[#allocation10_spill] sm:$0xff] %v7926_v59  ;;  %v6734_v36 = vpop.f32.mrb[35].mxu1  ;;  %v7970_v60 = vld [vmem:[%s8512_s1 + $0x20] sm:$0xff] }
 0x747   :  { %v7928_v16 = vpop.f32.mrb[38].mxu0 }
 0x748   :  { %v7930_v3 = vpop.f32.mrb[36].mxu1  ;;  %v6739_v25 = vpop.f32.mrb[39].mxu0 }
 0x749   :  { %8531 = vst [vmem:[#allocation11_spill] sm:$0xff] %v7930_v3  ;;  %v6744_v14 = vpop.f32.mrb[37].mxu1 }
 0x74b   :  { %v7932_v4 = vpop.f32.mrb[40].mxu0 }
 0x74c   :  { %v6749_v30 = vpop.f32.mrb[41].mxu0 }
 0x74f   :  { %v3137_v54 = vpop.f32.mrb[38].mxu1 }
 0x750   :  { %v3687_v15 = vmul.f32 0.35355338, %v3137_v54  ;;  %v6754_v56 = vpop.f32.mrb[39].mxu1 }
 0x752   :  { %v7940_v27 = vadd.f32 %v7937_v18, %v3687_v15  ;;  %v3215_v22 = vpop.f32.mrb[42].mxu0 }
 0x753   :  { %v3688_v10 = vmul.f32 0.35355338, %v3215_v22  ;;  %v3293_v52 = vpop.f32.mrb[40].mxu1  ;;  %v6759_v53 = vpop.f32.mrb[43].mxu0 }
 0x754   :  { %v3689_v24 = vmul.f32 0.35355338, %v3293_v52  ;;  %v6764_v51 = vpop.f32.mrb[41].mxu1  ;;  %v3703_v29 = vsel %vm334_vm3, %v7940_v27, -inf  ;;  %v7978_v52 = vld [vmem:[%s8512_s1 + $0x28] sm:$0xff] }
 0x755   :  { %v7950_v13 = vadd.f32 %v7947_v38, %v3688_v10  ;;  %3704 = vmax.xlane.f32.xlu0 %v3703_v29 }
 0x756   :  { %v3697_v61 = vadd.f32 %v7955_v17, %v3689_v24  ;;  %v3371_v12 = vpop.f32.mrb[44].mxu0  ;;  %v7984_v24 = vld [vmem:[%s8512_s1 + $0x30] sm:$0xff] }
 0x757   :  { %v3690_v7 = vmul.f32 0.35355338, %v3371_v12  ;;  %v3449_v28 = vpop.f32.mrb[42].mxu1  ;;  %v6769_v19 = vpop.f32.mrb[45].mxu0  ;;  %v3706_v62 = vsel %vm334_vm3, %v7950_v13, -inf }
 0x758   :  { %v3691_v20 = vmul.f32 0.35355338, %v3449_v28  ;;  %v6774_v32 = vpop.f32.mrb[43].mxu1  ;;  %3707 = vmax.xlane.f32.xlu1 %v3706_v62  ;;  %v3709_v11 = vsel %vm334_vm3, %v3697_v61, -inf  ;;  %v7995_v62 = vld [vmem:[%s8512_s1 + $0x38] sm:$0xff]  ;;  %s7145_s1 = smov 40  }
 0x759   :  { %v3698_v40 = vadd.f32 %v7964_v23, %v3690_v7  ;;  %3710 = vmax.xlane.f32.xlu0 %v3709_v11  ;;  %v8006_v11 = vpop.permute.xlu1 %3951 }
 0x75a   :  { %v3699_v36 = vadd.f32 %v7970_v60, %v3691_v20  ;;  %v3527_v25 = vpop.f32.mrb[46].mxu0 }
 0x75b   :  { %v3692_v14 = vmul.f32 0.35355338, %v3527_v25  ;;  %v3605_v30 = vpop.f32.mrb[44].mxu1  ;;  %v6779_v54 = vpop.f32.mrb[47].mxu0  ;;  %v3712_v15 = vsel %vm334_vm3, %v3698_v40, -inf }
 0x75c   :  { %v3693_v56 = vmul.f32 0.35355338, %v3605_v30  ;;  %v6784_v22 = vpop.f32.mrb[45].mxu1  ;;  %v3715_v10 = vsel %vm334_vm3, %v3699_v36, -inf }
 0x75d   :  { %v3700_v53 = vadd.f32 %v7978_v52, %v3692_v14  ;;  %3713 = vmax.xlane.f32.xlu0 %v3712_v15  ;;  %3716 = vmax.xlane.f32.xlu1 %v3715_v10  ;;  %v8008_v25 = vpop.permute.xlu1 %4027  ;;  %v8010_v14 = vpop.permute.xlu0 %4103 }
 0x75e   :  { %v7987_v51 = vadd.f32 %v7984_v24, %v3693_v56  ;;  %v3683_v29 = vpop.f32.mrb[48].mxu0 }
 0x75f   :  { %v3694_v12 = vmul.f32 0.35355338, %v3683_v29  ;;  %v6789_v7 = vpop.f32.mrb[49].mxu0  ;;  %v3718_v28 = vsel %vm334_vm3, %v3700_v53, -inf }
 0x760   :  { %v3721_v19 = vsel %vm334_vm3, %v7987_v51, -inf }
 0x761   :  { %v7998_v20 = vadd.f32 %v7995_v62, %v3694_v12  ;;  %3719 = vmax.xlane.f32.xlu0 %v3718_v28  ;;  %3722 = vmax.xlane.f32.xlu1 %v3721_v19  ;;  %v8012_v30 = vpop.permute.xlu1 %4179  ;;  %v8014_v54 = vpop.permute.xlu0 %4255 }
 0x763   :  { %v3724_v32 = vsel %vm334_vm3, %v7998_v20, -inf }
 0x765   :  { %3725 = vmax.xlane.f32.xlu0 %v3724_v32  ;;  %v8016_v15 = vpop.permute.xlu1 %4331  ;;  %v8018_v56 = vpop.permute.xlu0 %4409 }
 0x769   :  { %v8020_v22 = vpop.permute.xlu1 %4487  ;;  %v8022_v10 = vpop.permute.xlu0 %4407 }
 0x76d   :  { %v8024_v29 = vpop.permute.xlu1 %4485 }
 0x772   :  { %4643 = vrot.lane.b32.xlu1 %v7282_v45, %s7143_s4 }
 0x77b   :  { %4565 = vrot.lane.b32.xlu0 %v7284_v46, %s7143_s4 }
 0x7e2   :  { %v3705_v12 = vpop.xlane.xlu0 %3704 }
 0x7e3   :  { %v3727_v7 = vsub.f32 %v7940_v27, %v3705_v12 }
 0x7e5   :  { %v3735_v28 = vmul.f32 1.442695, %v3727_v7  ;;  %v3708_v19 = vpop.xlane.xlu1 %3707 }
 0x7e6   :  { %v3728_v32 = vsub.f32 %v7950_v13, %v3708_v19  ;;  %v3711_v42 = vpop.xlane.xlu0 %3710 }
 0x7e7   :  { %7061 = vpow2.f32 %v3735_v28  ;;  %v3729_v63 = vsub.f32 %v3697_v61, %v3711_v42 }
 0x7e8   :  { %v3737_v21 = vmul.f32 1.442695, %v3728_v32 }
 0x7e9   :  { %v3739_v58 = vmul.f32 1.442695, %v3729_v63 }
 0x7ea   :  { %7063 = vpow2.f32 %v3737_v21  ;;  %v3714_v37 = vpop.xlane.xlu0 %3713  ;;  %v3717_v31 = vpop.xlane.xlu1 %3716 }
 0x7eb   :  { %7065 = vpow2.f32 %v3739_v58  ;;  %v3730_v34 = vsub.f32 %v3698_v40, %v3714_v37  ;;  %v3731_v33 = vsub.f32 %v3699_v36, %v3717_v31 }
 0x7ed   :  { %v3741_v26 = vmul.f32 1.442695, %v3730_v34  ;;  %v3743_v3 = vmul.f32 1.442695, %v3731_v33 }
 0x7ee   :  { %v3720_v59 = vpop.xlane.xlu0 %3719 }
 0x7ef   :  { %7067 = vpow2.f32 %v3741_v26  ;;  %v3732_v27 = vsub.f32 %v3700_v53, %v3720_v59 }
 0x7f0   :  { %7069 = vpow2.f32 %v3743_v3  ;;  %v3723_v3 = vpop.xlane.xlu1 %3722 }
 0x7f1   :  { %v7062_v12 = vpop.eup %7061  ;;  %v3745_v7 = vmul.f32 1.442695, %v3732_v27  ;;  %v3733_v61 = vsub.f32 %v7987_v51, %v3723_v3 }
 0x7f2   :  { %v3751_v13 = vsel %vm334_vm3, %v7062_v12, 0.0  ;;  %v3726_v40 = vpop.xlane.xlu0 %3725 }
 0x7f3   :  { %7071 = vpow2.f32 %v3745_v7  ;;  %3752 = vadd.xlane.f32.xlu1 %v3751_v13  ;;  %v3734_v36 = vsub.f32 %v7998_v20, %v3726_v40  ;;  %v3747_v53 = vmul.f32 1.442695, %v3733_v61 }
 0x7f4   :  { %v7064_v42 = vpop.eup %7063  ;;  %v8073_v51 = vpop.permute.xlu1 %4643 }
 0x7f5   :  { %v7066_v63 = vpop.eup %7065  ;;  %v3754_v21 = vsel %vm334_vm3, %v7064_v42, 0.0  ;;  %v3749_v28 = vmul.f32 1.442695, %v3734_v36  ;;  %7073 = vpow2.f32 %v3747_v53 }
 0x7f6   :  { %3755 = vadd.xlane.f32.xlu0 %v3754_v21  ;;  %v3757_v37 = vsel %vm334_vm3, %v7066_v63, 0.0  ;;  %v8075_v20 = vpop.permute.xlu0 %4565 }
 0x7f7   :  { %3758 = vadd.xlane.f32.xlu1 %v3757_v37  ;;  %7075 = vpow2.f32 %v3749_v28 }
 0x7f9   :  { %v8031_v34 = vpop.eup %7067 }
 0x7fa   :  { %v8033_v33 = vpop.eup %7069  ;;  %v3760_v26 = vsel %vm334_vm3, %v8031_v34, 0.0 }
 0x7fb   :  { %3761 = vadd.xlane.f32.xlu0 %v3760_v26  ;;  %v3763_v31 = vsel %vm334_vm3, %v8033_v33, 0.0 }
 0x7fc   :  { %3764 = vadd.xlane.f32.xlu1 %v3763_v31 }
 0x7fd   :  { %v8039_v58 = vpop.eup %7071 }
 0x7fe   :  { %v3766_v59 = vsel %vm334_vm3, %v8039_v58, 0.0 }
 0x7ff   :  { %3767 = vadd.xlane.f32.xlu0 %v3766_v59  ;;  %v8049_v19 = vpop.eup %7073 }
 0x800   :  { %v3769_v27 = vsel %vm334_vm3, %v8049_v19, 0.0 }
 0x801   :  { %v8051_v32 = vpop.eup %7075 }
 0x802   :  { %v3772_v7 = vsel %vm334_vm3, %v8051_v32, 0.0 }
 0x80d   :  { %4641 = vrot.lane.b32.xlu1 %v7282_v45, %s7144_s5 }
 0x815   :  { %4563 = vrot.lane.b32.xlu0 %v7284_v46, %s7144_s5 }
 0x831   :  { %3770 = vadd.xlane.f32.xlu1 %v3769_v27  ;;  %v8532_v27 = vmov 0.0  }
 0x834   :  { %3773 = vadd.xlane.f32.xlu0 %v3772_v7 }
 0x842   :  { %4799 = vrot.lane.b32.xlu1 %v7288_v47, %s7143_s4 }
 0x846   :  { %4797 = vrot.lane.b32.xlu1 %v7288_v47, %s7144_s5 }
 0x84a   :  { %4955 = vrot.lane.b32.xlu1 %v7294_v49, %s7143_s4  ;;  %4721 = vrot.lane.b32.xlu0 %v7290_v48, %s7143_s4 }
 0x84e   :  { %4953 = vrot.lane.b32.xlu1 %v7294_v49, %s7144_s5  ;;  %4719 = vrot.lane.b32.xlu0 %v7290_v48, %s7144_s5 }
 0x852   :  { %4877 = vrot.lane.b32.xlu0 %v7296_v50, %s7143_s4 }
 0x856   :  { %4875 = vrot.lane.b32.xlu0 %v7296_v50, %s7144_s5 }
 0x880   :  { %v3753_v13 = vpop.xlane.xlu1 %3752 }
 0x881   :  { %7077 = vrcp.f32 %v3753_v13 }
 0x883   :  { %v3756_v21 = vpop.xlane.xlu0 %3755 }
 0x884   :  { %7079 = vrcp.f32 %v3756_v21  ;;  %v3759_v37 = vpop.xlane.xlu1 %3758 }
 0x885   :  { %7081 = vrcp.f32 %v3759_v37 }
 0x888   :  { %v3762_v26 = vpop.xlane.xlu0 %3761 }
 0x889   :  { %7083 = vrcp.f32 %v3762_v26  ;;  %v3765_v31 = vpop.xlane.xlu1 %3764 }
 0x88a   :  { %7085 = vrcp.f32 %v3765_v31 }
 0x88b   :  { %v7078_v59 = vpop.eup %7077 }
 0x88c   :  { %v3768_v3 = vpop.xlane.xlu0 %3767  ;;  %v3783_v61 = vmul.f32 %v7078_v59, %v7062_v12 }
 0x88d   :  { %7087 = vrcp.f32 %v3768_v3 }
 0x88e   :  { %v7080_v40 = vpop.eup %7079  ;;  %v3791_v36 = vsel %vm359_vm4, %v3783_v61, 0.0 }
 0x88f   :  { %v7082_v53 = vpop.eup %7081  ;;  %6793 = vmatmul.mubr.msk.f32.vlgmr.msra.gmra.mrb[46].mxu1 %vm334_vm3, %v3791_v36  ;;  %v3784_v28 = vmul.f32 %v7080_v40, %v7064_v42 }
 0x890   :  { %6801 = vmatpush3.msra.mxu1 %v8006_v11  ;;  %6802 = vmatprep.mubr.msk.f32.mxu1 %vm7134_vm2, %v8532_v27  ;;  %v3785_v7 = vmul.f32 %v7082_v53, %v7066_v63 }
 0x891   :  { %6810 = vmatprep.subr.mxu1 %v8532_v27  ;;  %v3792_v12 = vsel %vm360_vm5, %v3784_v28, 0.0 }
 0x892   :  { %6798 = vmatmul.mubr.msk.f32.vlgmr.msra.gmra.mrb[50].mxu0 %vm334_vm3, %v3792_v12  ;;  %v3793_v13 = vsel %vm361_vm6, %v3785_v7, 0.0 }
 0x893   :  { %v7084_v21 = vpop.eup %7083  ;;  %6803 = vmatmul.mubr.msk.f32.vlgmr.msra.gmra.mrb[48].mxu1 %vm334_vm3, %v3793_v13  ;;  %6806 = vmatpush3.msra.mxu0 %v8008_v25 }
 0x894   :  { %v7086_v11 = vpop.eup %7085  ;;  %6811 = vmatpush3.msra.mxu1 %v8010_v14  ;;  %6807 = vmatprep.mubr.msk.f32.mxu0 %vm7134_vm2, %v8532_v27  ;;  %v3786_v42 = vmul.f32 %v7084_v21, %v8031_v34 }
 0x895   :  { %6812 = vmatprep.mubr.msk.f32.mxu1 %vm7134_vm2, %v8532_v27  ;;  %6815 = vmatprep.subr.mxu0 %v8532_v27  ;;  %v3787_v63 = vmul.f32 %v7086_v11, %v8033_v33 }
 0x896   :  { %6820 = vmatprep.subr.mxu1 %v8532_v27  ;;  %v3794_v25 = vsel %vm362_vm7, %v3786_v42, 0.0 }
 0x897   :  { %v7088_v37 = vpop.eup %7087  ;;  %6808 = vmatmul.mubr.msk.f32.vlgmr.msra.gmra.mrb[52].mxu0 %vm334_vm3, %v3794_v25  ;;  %v3795_v14 = vsel %vm363_vm8, %v3787_v63, 0.0 }
 0x898   :  { %6813 = vmatmul.mubr.msk.f32.vlgmr.msra.gmra.mrb[50].mxu1 %vm334_vm3, %v3795_v14  ;;  %6816 = vmatpush3.msra.mxu0 %v8012_v30  ;;  %v3788_v34 = vmul.f32 %v7088_v37, %v8039_v58  ;;  %v4642_v30 = vpop.permute.xlu1 %4641 }
 0x899   :  { %6821 = vmatpush3.msra.mxu1 %v8014_v54  ;;  %6817 = vmatprep.mubr.msk.f32.mxu0 %vm7134_vm2, %v8532_v27  ;;  %v4564_v54 = vpop.permute.xlu0 %4563 }
 0x89a   :  { %6825 = vmatprep.subr.mxu0 %v8532_v27  ;;  %v3796_v33 = vsel %vm364_vm9, %v3788_v34, 0.0  ;;  %6822 = vmatprep.mubr.msk.f32.mxu1 %vm7134_vm2, %v8532_v27 }
 0x89b   :  { %6818 = vmatmul.mubr.msk.f32.vlgmr.msra.gmra.mrb[54].mxu0 %vm334_vm3, %v3796_v33  ;;  %6830 = vmatprep.subr.mxu1 %v8532_v27 }
 0x89c   :  { %6826 = vmatpush3.msra.mxu0 %v8016_v15  ;;  %6827 = vmatprep.mubr.msk.f32.mxu0 %vm7134_vm2, %v8532_v27 }
 0x89d   :  { %6835 = vmatprep.subr.mxu0 %v8532_v27 }
 0x8be   :  { %v3771_v58 = vpop.xlane.xlu1 %3770 }
 0x8bf   :  { %7089 = vrcp.f32 %v3771_v58 }
 0x8c1   :  { %v3774_v26 = vpop.xlane.xlu0 %3773 }
 0x8c2   :  { %7091 = vrcp.f32 %v3774_v26  ;;  %v4800_v15 = vpop.permute.xlu1 %4799 }
 0x8c5   :  { %v4722_v59 = vpop.permute.xlu0 %4721 }
 0x8c9   :  { %v7090_v31 = vpop.eup %7089  ;;  %v4720_v53 = vpop.permute.xlu0 %4719 }
 0x8ca   :  { %v3789_v3 = vmul.f32 %v7090_v31, %v8049_v19 }
 0x8cc   :  { %v7092_v61 = vpop.eup %7091  ;;  %v3797_v40 = vsel %vm365_vm10, %v3789_v3, 0.0 }
 0x8cd   :  { %6823 = vmatmul.mubr.msk.f32.vlgmr.msra.gmra.mrb[52].mxu1 %vm334_vm3, %v3797_v40  ;;  %v3790_v36 = vmul.f32 %v7092_v61, %v8051_v32 }
 0x8ce   :  { %6831 = vmatpush3.xpose.msk.msra.mxu1 %vm334_vm3, %v8018_v56  ;;  %6832 = vmatprep.mubr.msk.f32.mxu1 %vm7134_vm2, %v8532_v27  ;;  %v4798_v56 = vpop.permute.xlu1 %4797 }
 0x8cf   :  { %6840 = vmatprep.subr.mxu1 %v8532_v27  ;;  %v3798_v19 = vsel %vm366_vm11, %v3790_v36, 0.0 }
 0x8d0   :  { %6828 = vmatmul.mubr.msk.f32.vlgmr.msra.gmra.mrb[56].mxu0 %vm334_vm3, %v3798_v19 }
 0x8d1   :  { %6833 = vmatmul.mubr.msk.f32.vlgmr.msra.gmra.mrb[54].mxu1 %vm334_vm3, %v8022_v10  ;;  %6836 = vmatpush3.xpose.msk.msra.mxu0 %vm334_vm3, %v8020_v22  ;;  %v4878_v22 = vpop.permute.xlu0 %4877 }
 0x8d2   :  { %6841 = vmatpush3.xpose.msk.msra.mxu1 %vm334_vm3, %v8075_v20  ;;  %6837 = vmatprep.mubr.msk.f32.mxu0 %vm7134_vm2, %v8532_v27  ;;  %v4956_v10 = vpop.permute.xlu1 %4955 }
 0x8d3   :  { %6842 = vmatprep.mubr.msk.f32.mxu1 %vm7134_vm2, %v8532_v27  ;;  %6845 = vmatprep.subr.mxu0 %v8532_v27 }
 0x8d4   :  { %6850 = vmatprep.subr.mxu1 %v8532_v27  ;;  %6838 = vmatmul.mubr.msk.f32.vlgmr.msra.gmra.mrb[58].mxu0 %vm334_vm3, %v8024_v29 }
 0x8d5   :  { %6843 = vmatmul.mubr.msk.f32.vlgmr.msra.gmra.mrb[56].mxu1 %vm334_vm3, %v4564_v54  ;;  %6846 = vmatpush3.xpose.msk.msra.mxu0 %vm334_vm3, %v8073_v51  ;;  %v4876_v29 = vpop.permute.xlu0 %4875 }
 0x8d6   :  { %6851 = vmatpush3.xpose.msk.msra.mxu1 %vm334_vm3, %v4722_v59  ;;  %6847 = vmatprep.mubr.msk.f32.mxu0 %vm7134_vm2, %v8532_v27  ;;  %v4954_v32 = vpop.permute.xlu1 %4953 }
 0x8d7   :  { %6852 = vmatprep.mubr.msk.f32.mxu1 %vm7134_vm2, %v8532_v27  ;;  %6855 = vmatprep.subr.mxu0 %v8532_v27 }
 0x8d8   :  { %6860 = vmatprep.subr.mxu1 %v8532_v27  ;;  %6848 = vmatmul.mubr.msk.f32.vlgmr.msra.gmra.mrb[60].mxu0 %vm334_vm3, %v4642_v30 }
 0x8d9   :  { %6853 = vmatmul.mubr.msk.f32.vlgmr.msra.gmra.mrb[58].mxu1 %vm334_vm3, %v4720_v53  ;;  %6856 = vmatpush3.xpose.msk.msra.mxu0 %vm334_vm3, %v4800_v15 }
 0x8da   :  { %6861 = vmatpush3.xpose.msk.msra.mxu1 %vm334_vm3, %v4878_v22  ;;  %6857 = vmatprep.mubr.msk.f32.mxu0 %vm7134_vm2, %v8532_v27 }
 0x8db   :  { %6862 = vmatprep.mubr.msk.f32.mxu1 %vm7134_vm2, %v8532_v27  ;;  %6865 = vmatprep.subr.mxu0 %v8532_v27 }
 0x8dc   :  { %6858 = vmatmul.mubr.msk.f32.vlgmr.msra.gmra.mrb[62].mxu0 %vm334_vm3, %v4798_v56  ;;  %6870 = vmatprep.subr.mxu1 %v8532_v27 }
 0x8dd   :  { %6863 = vmatmul.mubr.msk.f32.vlgmr.msra.gmra.mrb[60].mxu1 %vm334_vm3, %v4876_v29  ;;  %6866 = vmatpush3.xpose.msk.msra.mxu0 %vm334_vm3, %v4956_v10 }
 0x8de   :  { %6867 = vmatprep.mubr.msk.f32.mxu0 %vm7134_vm2, %v8532_v27  ;;  %6875 = vmatprep.subr.mxu0 %v8532_v27 }
 0x8df   :  { %6872 = vmatprep.mubr.msk.f32.mxu1 %vm7134_vm2, %v8532_v27 }
 0x8e0   :  { %6868 = vmatmul.mubr.msk.f32.vlgmr.msra.gmra.mrb[64].mxu0 %vm334_vm3, %v4954_v32 }
 0x8e1   :  { %6877 = vmatprep.mubr.msk.f32.mxu0 %vm7134_vm2, %v8532_v27 }
 0x962   :  { %v8180_v51 = vpop.f32.mrb[46].mxu1 }
 0x963   :  { %v6794_v20 = vpop.f32.mrb[47].mxu1 }
 0x965   :  { %v8182_v28 = vpop.f32.mrb[50].mxu0 }
 0x966   :  { %v8184_v7 = vpop.f32.mrb[48].mxu1  ;;  %v6799_v12 = vpop.f32.mrb[51].mxu0 }
 0x967   :  { %v6804_v13 = vpop.f32.mrb[49].mxu1 }
 0x96a   :  { %v8186_v21 = vpop.f32.mrb[52].mxu0 }
 0x96b   :  { %v8188_v11 = vpop.f32.mrb[50].mxu1  ;;  %v6809_v42 = vpop.f32.mrb[53].mxu0 }
 0x96c   :  { %v6814_v63 = vpop.f32.mrb[51].mxu1 }
 0x96e   :  { %v8190_v25 = vpop.f32.mrb[54].mxu0 }
 0x96f   :  { %v6819_v37 = vpop.f32.mrb[55].mxu0 }
 0x9a0   :  { %v8192_v14 = vpop.f32.mrb[52].mxu1 }
 0x9a1   :  { %v6824_v34 = vpop.f32.mrb[53].mxu1 }
 0x9a3   :  { %v8194_v33 = vpop.f32.mrb[56].mxu0 }
 0x9a4   :  { %v4481_v30 = vpop.f32.mrb[54].mxu1  ;;  %v6829_v54 = vpop.f32.mrb[57].mxu0 }
 0x9a5   :  { %v5031_v58 = vmul.f32 0.35355338, %v4481_v30  ;;  %v6834_v26 = vpop.f32.mrb[55].mxu1 }
 0x9a7   :  { %v5039_v31 = vadd.f32 %v7937_v18, %v5031_v58  ;;  %v4559_v59 = vpop.f32.mrb[58].mxu0 }
 0x9a8   :  { %v5032_v3 = vmul.f32 0.35355338, %v4559_v59  ;;  %v4637_v61 = vpop.f32.mrb[56].mxu1  ;;  %v6839_v40 = vpop.f32.mrb[59].mxu0 }
 0x9a9   :  { %v5033_v15 = vmul.f32 0.35355338, %v4637_v61  ;;  %v6844_v36 = vpop.f32.mrb[57].mxu1  ;;  %v5047_v19 = vsel %vm334_vm3, %v5039_v31, -inf }
 0x9aa   :  { %v5040_v53 = vadd.f32 %v7947_v38, %v5032_v3  ;;  %5048 = vmax.xlane.f32.xlu0 %v5047_v19 }
 0x9ab   :  { %v5041_v56 = vadd.f32 %v7955_v17, %v5033_v15  ;;  %v4715_v22 = vpop.f32.mrb[60].mxu0 }
 0x9ac   :  { %v5034_v10 = vmul.f32 0.35355338, %v4715_v22  ;;  %v4793_v29 = vpop.f32.mrb[58].mxu1  ;;  %v6849_v32 = vpop.f32.mrb[61].mxu0  ;;  %v5050_v20 = vsel %vm334_vm3, %v5040_v53, -inf }
 0x9ad   :  { %v5035_v18 = vmul.f32 0.35355338, %v4793_v29  ;;  %v6854_v12 = vpop.f32.mrb[59].mxu1  ;;  %5051 = vmax.xlane.f32.xlu1 %v5050_v20  ;;  %v5053_v13 = vsel %vm334_vm3, %v5041_v56, -inf }
 0x9ae   :  { %v5042_v42 = vadd.f32 %v7964_v23, %v5034_v10  ;;  %5054 = vmax.xlane.f32.xlu0 %v5053_v13 }
 0x9af   :  { %v5043_v63 = vadd.f32 %v7970_v60, %v5035_v18  ;;  %v4871_v38 = vpop.f32.mrb[62].mxu0 }
 0x9b0   :  { %v5036_v37 = vmul.f32 0.35355338, %v4871_v38  ;;  %v4949_v34 = vpop.f32.mrb[60].mxu1  ;;  %v6859_v17 = vpop.f32.mrb[63].mxu0  ;;  %v5056_v30 = vsel %vm334_vm3, %v5042_v42, -inf }
 0x9b1   :  { %v5037_v54 = vmul.f32 0.35355338, %v4949_v34  ;;  %v6864_v58 = vpop.f32.mrb[61].mxu1  ;;  %v5059_v26 = vsel %vm334_vm3, %v5043_v63, -inf }
 0x9b2   :  { %v5044_v59 = vadd.f32 %v7978_v52, %v5036_v37  ;;  %5057 = vmax.xlane.f32.xlu0 %v5056_v30  ;;  %5060 = vmax.xlane.f32.xlu1 %v5059_v26 }
 0x9b3   :  { %v5045_v3 = vadd.f32 %v7984_v24, %v5037_v54  ;;  %v5027_v23 = vpop.f32.mrb[64].mxu0 }
 0x9b4   :  { %v5038_v61 = vmul.f32 0.35355338, %v5027_v23  ;;  %v6869_v40 = vpop.f32.mrb[65].mxu0  ;;  %v5062_v60 = vsel %vm334_vm3, %v5044_v59, -inf }
 0x9b5   :  { %v5065_v15 = vsel %vm334_vm3, %v5045_v3, -inf }
 0x9b6   :  { %v5046_v36 = vadd.f32 %v7995_v62, %v5038_v61  ;;  %5063 = vmax.xlane.f32.xlu0 %v5062_v60  ;;  %5066 = vmax.xlane.f32.xlu1 %v5065_v15 }
 0x9b8   :  { %v5068_v19 = vsel %vm334_vm3, %v5046_v36, -inf }
 0x9ba   :  { %5069 = vmax.xlane.f32.xlu0 %v5068_v19 }
 0x9c7   :  { %5143 = vrot.lane.b32.xlu1 %v7279_v44, %s7145_s1 }
 0x9cb   :  { %5295 = vrot.lane.b32.xlu1 %v7284_v46, %s7145_s1 }
 0x9cf   :  { %5371 = vrot.lane.b32.xlu1 %v7282_v45, %s7145_s1 }
 0x9d0   :  { %5219 = vrot.lane.b32.xlu0 %v7277_v43, %s7145_s1 }
 0x9d3   :  { %5523 = vrot.lane.b32.xlu1 %v7288_v47, %s7145_s1 }
 0x9d4   :  { %5447 = vrot.lane.b32.xlu0 %v7290_v48, %s7145_s1 }
 0xa37   :  { %v5049_v52 = vpop.xlane.xlu0 %5048 }
 0xa38   :  { %v5071_v24 = vsub.f32 %v5039_v31, %v5049_v52 }
 0xa3a   :  { %v5079_v62 = vmul.f32 1.442695, %v5071_v24  ;;  %v5052_v22 = vpop.xlane.xlu1 %5051 }
 0xa3b   :  { %v5072_v44 = vsub.f32 %v5040_v53, %v5052_v22  ;;  %v5055_v10 = vpop.xlane.xlu0 %5054 }
 0xa3c   :  { %7093 = vpow2.f32 %v5079_v62  ;;  %v5073_v46 = vsub.f32 %v5041_v56, %v5055_v10 }
 0xa3d   :  { %v5081_v29 = vmul.f32 1.442695, %v5072_v44 }
 0xa3e   :  { %v5083_v32 = vmul.f32 1.442695, %v5073_v46 }
 0xa3f   :  { %7095 = vpow2.f32 %v5081_v29  ;;  %v5058_v45 = vpop.xlane.xlu0 %5057  ;;  %v5061_v20 = vpop.xlane.xlu1 %5060 }
 0xa40   :  { %7097 = vpow2.f32 %v5083_v32  ;;  %v5074_v43 = vsub.f32 %v5042_v42, %v5058_v45  ;;  %v5075_v18 = vsub.f32 %v5043_v63, %v5061_v20 }
 0xa42   :  { %v5085_v47 = vmul.f32 1.442695, %v5074_v43  ;;  %v5087_v12 = vmul.f32 1.442695, %v5075_v18 }
 0xa43   :  { %v5064_v13 = vpop.xlane.xlu0 %5063  ;;  %v5067_v48 = vpop.xlane.xlu1 %5066 }
 0xa44   :  { %7099 = vpow2.f32 %v5085_v47  ;;  %v5076_v31 = vsub.f32 %v5044_v59, %v5064_v13  ;;  %v5077_v38 = vsub.f32 %v5045_v3, %v5067_v48 }
 0xa45   :  { %7101 = vpow2.f32 %v5087_v12 }
 0xa46   :  { %v8224_v53 = vpop.eup %7093  ;;  %v5089_v37 = vmul.f32 1.442695, %v5076_v31  ;;  %v5091_v56 = vmul.f32 1.442695, %v5077_v38 }
 0xa47   :  { %v5070_v34 = vpop.xlane.xlu0 %5069  ;;  %v5144_v17 = vpop.permute.xlu1 %5143  ;;  %v5095_v30 = vsel %vm334_vm3, %v8224_v53, 0.0 }
 0xa48   :  { %7103 = vpow2.f32 %v5089_v37  ;;  %v5078_v42 = vsub.f32 %v5046_v36, %v5070_v34  ;;  %5096 = vadd.xlane.f32.xlu1 %v5095_v30  ;;  %6871 = vmatpush3.msra.mxu1 %v5144_v17  ;;  %v6962_v34 = vpack.c.bf16 %v5881_v9, %v5880_v8  ;;  %v8539_v9 = vld [vmem:[#allocation6_spill] sm:$0xff] }
 0xa49   :  { %v8228_v63 = vpop.eup %7095  ;;  %7105 = vpow2.f32 %v5091_v56  ;;  %6880 = vmatprep.subr.mxu1 %v8532_v27 }
 0xa4a   :  { %v8231_v54 = vpop.eup %7097  ;;  %v5093_v58 = vmul.f32 1.442695, %v5078_v42  ;;  %v5098_v26 = vsel %vm334_vm3, %v8228_v63, 0.0 }
 0xa4b   :  { %v5220_v59 = vpop.permute.xlu0 %5219  ;;  %5099 = vadd.xlane.f32.xlu0 %v5098_v26  ;;  %v5101_v3 = vsel %vm334_vm3, %v8231_v54, 0.0 }
 0xa4c   :  { %7107 = vpow2.f32 %v5093_v58  ;;  %6876 = vmatpush3.msra.mxu0 %v5220_v59  ;;  %5102 = vadd.xlane.f32.xlu1 %v5101_v3  ;;  %v7149_v59 = vmov 0  }
 0xa4d   :  { %6885 = vmatprep.subr.mxu0 %v8532_v27  ;;  %6996 = vset.pattern.permute.xlu1 %v7149_v59 }
 0xa4e   :  { %v8238_v23 = vpop.eup %7099  ;;  %6995 = vset.pattern.permute.xlu0 %v7149_v59 }
 0xa4f   :  { %v8240_v61 = vpop.eup %7101  ;;  %v5104_v40 = vsel %vm334_vm3, %v8238_v23, 0.0 }
 0xa50   :  { %5105 = vadd.xlane.f32.xlu0 %v5104_v40  ;;  %v5107_v60 = vsel %vm334_vm3, %v8240_v61, 0.0 }
 0xa51   :  { %5108 = vadd.xlane.f32.xlu1 %v5107_v60 }
 0xa52   :  { %v8246_v15 = vpop.eup %7103 }
 0xa53   :  { %v8248_v36 = vpop.eup %7105  ;;  %v5110_v19 = vsel %vm334_vm3, %v8246_v15, 0.0 }
 0xa54   :  { %5111 = vadd.xlane.f32.xlu0 %v5110_v19  ;;  %v5113_v52 = vsel %vm334_vm3, %v8248_v36, 0.0 }
 0xa55   :  { %5114 = vadd.xlane.f32.xlu1 %v5113_v52  ;;  %v5872_v52 = vld [vmem:[%s8514_s2] sm:$0xff] }
 0xa56   :  { %v8254_v24 = vpop.eup %7107 }
 0xa57   :  { %v5116_v62 = vsel %vm334_vm3, %v8254_v24, 0.0 }
 0xa58   :  { %5117 = vadd.xlane.f32.xlu0 %v5116_v62 }
 0xa66   :  { %5675 = vrot.lane.b32.xlu1 %v7294_v49, %s7145_s1  ;;  %v8533_v49 = vld [vmem:[#allocation10_spill] sm:$0xff] }
 0xa6a   :  { %5761 = vrot.lane.b32.xlu1 %v7920_v35, %s7146_s23 }
 0xa6e   :  { %5793 = vrot.lane.b32.xlu1 %v8182_v28, %s7147_s24  ;;  %5599 = vrot.lane.b32.xlu0 %v7296_v50, %s7145_s1  ;;  %v8534_v50 = vld [vmem:[#allocation11_spill] sm:$0xff] }
 0xa72   :  { %5765 = vrot.lane.b32.xlu1 %v7924_v41, %s7146_s23  ;;  %5759 = vrot.lane.b32.xlu0 %v7918_v55, %s7146_s23  ;;  %v5296_v55 = vpop.permute.xlu1 %5295 }
 0xa76   :  { %5797 = vrot.lane.b32.xlu1 %v8186_v21, %s7147_s24  ;;  %5791 = vrot.lane.b32.xlu0 %v8180_v51, %s7147_s24  ;;  %v5372_v35 = vpop.permute.xlu1 %5371 }
 0xa7a   :  { %5769 = vrot.lane.b32.xlu1 %v7928_v16, %s7146_s23  ;;  %5763 = vrot.lane.b32.xlu0 %v7922_v57, %s7146_s23  ;;  %v5524_v41 = vpop.permute.xlu1 %5523  ;;  %v5448_v57 = vpop.permute.xlu0 %5447 }
 0xa7e   :  { %5801 = vrot.lane.b32.xlu1 %v8190_v25, %s7147_s24  ;;  %5795 = vrot.lane.b32.xlu0 %v8184_v7, %s7147_s24 }
 0xa82   :  { %5773 = vrot.lane.b32.xlu1 %v7932_v4, %s7146_s23  ;;  %5767 = vrot.lane.b32.xlu0 %v8533_v49, %s7146_s23  ;;  %v5873_v49 = vld [vmem:[%s8514_s2 + $0x8] sm:$0xff] }
 0xa86   :  { %5805 = vrot.lane.b32.xlu1 %v8194_v33, %s7147_s24  ;;  %5799 = vrot.lane.b32.xlu0 %v8188_v11, %s7147_s24 }
 0xa8a   :  { %5771 = vrot.lane.b32.xlu0 %v8534_v50, %s7146_s23  ;;  %v5875_v50 = vld [vmem:[%s8514_s2 + $0x18] sm:$0xff] }
 0xa8e   :  { %5803 = vrot.lane.b32.xlu0 %v8192_v14, %s7147_s24 }
 0xad5   :  { %v5097_v16 = vpop.xlane.xlu1 %5096 }
 0xad6   :  { %7109 = vrcp.f32 %v5097_v16  ;;  %v5878_v16 = vld [vmem:[%s8514_s2 + $0x30] sm:$0xff] }
 0xad8   :  { %v5100_v51 = vpop.xlane.xlu0 %5099 }
 0xad9   :  { %7111 = vrcp.f32 %v5100_v51  ;;  %v5103_v28 = vpop.xlane.xlu1 %5102 }
 0xada   :  { %7113 = vrcp.f32 %v5103_v28 }
 0xadd   :  { %v5106_v4 = vpop.xlane.xlu0 %5105 }
 0xade   :  { %7115 = vrcp.f32 %v5106_v4  ;;  %v5109_v7 = vpop.xlane.xlu1 %5108 }
 0xadf   :  { %7117 = vrcp.f32 %v5109_v7 }
 0xae0   :  { %v7110_v21 = vpop.eup %7109 }
 0xae1   :  { %v5112_v11 = vpop.xlane.xlu0 %5111  ;;  %v5127_v25 = vmul.f32 %v7110_v21, %v8224_v53 }
 0xae2   :  { %7119 = vrcp.f32 %v5112_v11  ;;  %v5115_v14 = vpop.xlane.xlu1 %5114 }
 0xae3   :  { %v7112_v33 = vpop.eup %7111  ;;  %7121 = vrcp.f32 %v5115_v14  ;;  %v5135_v22 = vsel %vm359_vm4, %v5127_v25, 0.0 }
 0xae4   :  { %v7114_v44 = vpop.eup %7113  ;;  %6873 = vmatmul.mubr.msk.f32.vlgmr.msra.gmra.mrb[62].mxu1 %vm334_vm3, %v5135_v22  ;;  %v5128_v10 = vmul.f32 %v7112_v33, %v8228_v63 }
 0xae5   :  { %6881 = vmatpush3.msra.mxu1 %v5296_v55  ;;  %v5118_v46 = vpop.xlane.xlu0 %5117  ;;  %6882 = vmatprep.mubr.msk.f32.mxu1 %vm7134_vm2, %v8532_v27  ;;  %v5129_v29 = vmul.f32 %v7114_v44, %v8231_v54  ;;  %v5874_v55 = vld [vmem:[%s8514_s2 + $0x10] sm:$0xff] }
 0xae6   :  { %7123 = vrcp.f32 %v5118_v46  ;;  %6890 = vmatprep.subr.mxu1 %v8532_v27  ;;  %v5136_v32 = vsel %vm360_vm5, %v5128_v10, 0.0  ;;  %v5676_v38 = vpop.permute.xlu1 %5675 }
 0xae7   :  { %6878 = vmatmul.mubr.msk.f32.vlgmr.msra.gmra.mrb[66].mxu0 %vm334_vm3, %v5136_v32  ;;  %v5137_v0 = vsel %vm361_vm6, %v5129_v29, 0.0 }
 0xae8   :  { %v7116_v45 = vpop.eup %7115  ;;  %6883 = vmatmul.mubr.msk.f32.vlgmr.msra.gmra.mrb[64].mxu1 %vm334_vm3, %v5137_v0  ;;  %6886 = vmatpush3.msra.mxu0 %v5372_v35  ;;  %v5877_v35 = vld [vmem:[%s8514_s2 + $0x28] sm:$0xff]  ;;  %v8535_v0 = vld [vmem:[#allocation2_spill] sm:$0xff] }
 0xae9   :  { %v7118_v20 = vpop.eup %7117  ;;  %6891 = vmatpush3.msra.mxu1 %v5448_v57  ;;  %6887 = vmatprep.mubr.msk.f32.mxu0 %vm7134_vm2, %v8532_v27  ;;  %v5130_v43 = vmul.f32 %v7116_v45, %v8238_v23  ;;  %v5600_v13 = vpop.permute.xlu0 %5599  ;;  %v5879_v57 = vld [vmem:[%s8514_s2 + $0x38] sm:$0xff] }
 0xaea   :  { %6892 = vmatprep.mubr.msk.f32.mxu1 %vm7134_vm2, %v8532_v27  ;;  %6895 = vmatprep.subr.mxu0 %v8532_v27  ;;  %v5131_v1 = vmul.f32 %v7118_v20, %v8240_v61  ;;  %v5762_v28 = vpop.permute.xlu1 %5761 }
 0xaeb   :  { %6900 = vmatprep.subr.mxu1 %v8532_v27  ;;  %v5138_v2 = vsel %vm362_vm7, %v5130_v43, 0.0 }
 0xaec   :  { %v7120_v18 = vpop.eup %7119  ;;  %6888 = vmatmul.mubr.msk.f32.vlgmr.msra.gmra.mrb[68].mxu0 %vm334_vm3, %v5138_v2  ;;  %v5139_v47 = vsel %vm363_vm8, %v5131_v1, 0.0 }
 0xaed   :  { %v7122_v12 = vpop.eup %7121  ;;  %6893 = vmatmul.mubr.msk.f32.vlgmr.msra.gmra.mrb[66].mxu1 %vm334_vm3, %v5139_v47  ;;  %6896 = vmatpush3.msra.mxu0 %v5524_v41  ;;  %v5132_v48 = vmul.f32 %v7120_v18, %v8246_v15  ;;  %v5876_v41 = vld [vmem:[%s8514_s2 + $0x20] sm:$0xff]  ;;  %v5760_v51 = vpop.permute.xlu0 %5759  ;;  %v8536_v18 = vld [vmem:[#allocation3_spill] sm:$0xff] }
 0xaee   :  { %6901 = vmatpush3.msra.mxu1 %v5600_v13  ;;  %6897 = vmatprep.mubr.msk.f32.mxu0 %vm7134_vm2, %v8532_v27  ;;  %v5133_v5 = vmul.f32 %v7122_v12, %v8248_v36  ;;  %v5794_v7 = vpop.permute.xlu1 %5793  ;;  %v5847_v45 = vsel %vm334_vm3, %v8535_v0, %v5760_v51  ;;  %v5848_v47 = vsel %vm334_vm3, %v8536_v18, %v5762_v28  ;;  %v8537_v13 = vld [vmem:[#allocation4_spill] sm:$0xff] }
 0xaef   :  { %6902 = vmatprep.mubr.msk.f32.mxu1 %vm7134_vm2, %v8532_v27  ;;  %6905 = vmatprep.subr.mxu0 %v8532_v27  ;;  %v5140_v6 = vsel %vm364_vm9, %v5132_v48, 0.0  ;;  %v5856_v12 = vsel %vm54_vm0, %v5848_v47, %v5794_v7 }
 0xaf0   :  { %v7124_v31 = vpop.eup %7123  ;;  %6898 = vmatmul.mubr.msk.f32.vlgmr.msra.gmra.mrb[70].mxu0 %vm334_vm3, %v5140_v6  ;;  %v5141_v53 = vsel %vm365_vm10, %v5133_v5, 0.0  ;;  %6963 = vmatprep.subr.bf16.mxu1 %v6962_v34 }
 0xaf1   :  { %6903 = vmatmul.mubr.msk.f32.vlgmr.msra.gmra.mrb[68].mxu1 %vm334_vm3, %v5141_v53  ;;  %6906 = vmatpush3.msra.mxu0 %v5676_v38  ;;  %v5134_v37 = vmul.f32 %v7124_v31, %v8254_v24  ;;  %v5792_v4 = vpop.permute.xlu0 %5791 }
 0xaf2   :  { %6907 = vmatprep.mubr.msk.f32.mxu0 %vm7134_vm2, %v8532_v27  ;;  %6965 = vmatpush3.bf16.msra.mxu1 %v6962_v34  ;;  %v5882_v27 = vld [vmem:[%s8513_s6 + $0x10] sm:$0xff]  ;;  %v5766_v11 = vpop.permute.xlu1 %5765  ;;  %v5855_v43 = vsel %vm54_vm0, %v5847_v45, %v5792_v4 }
 0xaf3   :  { %v5142_v56 = vsel %vm366_vm11, %v5134_v37, 0.0  ;;  %v6966_v17 = vpack.c.bf16 %v5883_v39, %v5882_v27  ;;  %v8538_v37 = vld [vmem:[#allocation5_spill] sm:$0xff] }
 0xaf4   :  { %6908 = vmatmul.mubr.msk.f32.vlgmr.msra.gmra.mrb[72].mxu0 %vm334_vm3, %v5142_v56  ;;  %v5850_v56 = vsel %vm334_vm3, %v8538_v37, %v5766_v11 }
 0xaf5   :  { %6967 = vmatprep.subr.bf16.mxu1 %v6966_v17  ;;  %v5764_v21 = vpop.permute.xlu0 %5763 }
 0xaf6   :  { %6969 = vmatpush3.bf16.msra.mxu1 %v6966_v17  ;;  %v5798_v14 = vpop.permute.xlu1 %5797  ;;  %v5849_v48 = vsel %vm334_vm3, %v8537_v13, %v5764_v21 }
 0xaf7   :  { %v5858_v8 = vsel %vm54_vm0, %v5850_v56, %v5798_v14 }
 0xaf9   :  { %v5796_v25 = vpop.permute.xlu0 %5795 }
 0xafa   :  { %v5770_v22 = vpop.permute.xlu1 %5769  ;;  %v5857_v6 = vsel %vm54_vm0, %v5849_v48, %v5796_v25 }
 0xafd   :  { %v5768_v33 = vpop.permute.xlu0 %5767 }
 0xafe   :  { %v5802_v10 = vpop.permute.xlu1 %5801  ;;  %v5851_v34 = vsel %vm334_vm3, %v8539_v9, %v5768_v33 }
 0xb01   :  { %v5800_v44 = vpop.permute.xlu0 %5799 }
 0xb02   :  { %v5774_v29 = vpop.permute.xlu1 %5773  ;;  %v5859_v39 = vsel %vm54_vm0, %v5851_v34, %v5800_v44 }
 0xb05   :  { %v5772_v46 = vpop.permute.xlu0 %5771 }
 0xb06   :  { %v5806_v20 = vpop.permute.xlu1 %5805 }
 0xb09   :  { %v5804_v32 = vpop.permute.xlu0 %5803 }
 0xbb7   :  { %v5215_v30 = vpop.f32.mrb[62].mxu1 }
 0xbb8   :  { %5823 = vrot.lane.b32.xlu0 %v5215_v30, %s7148_s29  ;;  %v6874_v42 = vpop.f32.mrb[63].mxu1 }
 0xbba   :  { %v5291_v63 = vpop.f32.mrb[66].mxu0 }
 0xbbb   :  { %v5367_v54 = vpop.f32.mrb[64].mxu1  ;;  %v6879_v58 = vpop.f32.mrb[67].mxu0  ;;  %5825 = vrot.lane.b32.xlu1 %v5291_v63, %s7148_s29  ;;  %v8540_v63 = vld [vmem:[#allocation7_spill] sm:$0xff] }
 0xbbc   :  { %5827 = vrot.lane.b32.xlu0 %v5367_v54, %s7148_s29  ;;  %v6884_v26 = vpop.f32.mrb[65].mxu1  ;;  %v5852_v54 = vsel %vm334_vm3, %v8540_v63, %v5770_v22 }
 0xbbd   :  { %v5860_v58 = vsel %vm54_vm0, %v5852_v54, %v5802_v10  ;;  %v8541_v26 = vld [vmem:[#allocation8_spill] sm:$0xff] }
 0xbbe   :  { %v5853_v59 = vsel %vm334_vm3, %v8541_v26, %v5772_v46 }
 0xbbf   :  { %v5443_v3 = vpop.f32.mrb[68].mxu0 }
 0xbc0   :  { %v5519_v23 = vpop.f32.mrb[66].mxu1  ;;  %5829 = vrot.lane.b32.xlu1 %v5443_v3, %s7148_s29  ;;  %v6889_v61 = vpop.f32.mrb[69].mxu0 }
 0xbc1   :  { %5831 = vrot.lane.b32.xlu0 %v5519_v23, %s7148_s29  ;;  %v6894_v40 = vpop.f32.mrb[67].mxu1  ;;  %v5861_v23 = vsel %vm54_vm0, %v5853_v59, %v5804_v32 }
 0xbc3   :  { %v5595_v60 = vpop.f32.mrb[70].mxu0 }
 0xbc4   :  { %v5671_v15 = vpop.f32.mrb[68].mxu1  ;;  %5833 = vrot.lane.b32.xlu1 %v5595_v60, %s7148_s29  ;;  %v6899_v36 = vpop.f32.mrb[71].mxu0 }
 0xbc5   :  { %5835 = vrot.lane.b32.xlu0 %v5671_v15, %s7148_s29  ;;  %v6904_v19 = vpop.f32.mrb[69].mxu1  ;;  %v8542_v15 = vld [vmem:[#allocation9_spill] sm:$0xff] }
 0xbc6   :  { %v5854_v36 = vsel %vm334_vm3, %v8542_v15, %v5774_v29 }
 0xbc7   :  { %v5747_v24 = vpop.f32.mrb[72].mxu0  ;;  %v5862_v19 = vsel %vm54_vm0, %v5854_v36, %v5806_v20 }
 0xbc8   :  { %5837 = vrot.lane.b32.xlu1 %v5747_v24, %s7148_s29  ;;  %v6909_v62 = vpop.f32.mrb[73].mxu0 }
 0xbc9   :  { %6022 = vperm.xlu0 %6995, %v5872_v52   ;;  %v6076_v62 = vld [vmem:[%s8515_s8] sm:$0xff] }
 0xbcc   :  { %6027 = vperm.xlu1 %6996, %v5873_v49   ;;  %v6077_v49 = vld [vmem:[%s8515_s8 + $0x8] sm:$0xff] }
 0xbcd   :  { %6037 = vperm.xlu0 %6995, %v5875_v50   ;;  %v6970_v50 = vpack.c.bf16 %v6077_v49, %v6076_v62 }
 0xbcf   :  { %6971 = vmatprep.subr.bf16.mxu0 %v6970_v50 }
 0xbd0   :  { %6032 = vperm.xlu1 %6996, %v5874_v55   ;;  %6973 = vmatpush3.bf16.msra.mxu0 %v6970_v50  ;;  %v6078_v55 = vld [vmem:[%s8515_s8 + $0x10] sm:$0xff] }
 0xbd1   :  { %6047 = vperm.xlu0 %6995, %v5877_v35   ;;  %v6079_v35 = vld [vmem:[%s8515_s8 + $0x18] sm:$0xff] }
 0xbd4   :  { %6042 = vperm.xlu1 %6996, %v5876_v41   ;;  %v6974_v41 = vpack.c.bf16 %v6079_v35, %v6078_v55 }
 0xbd5   :  { %6057 = vperm.xlu0 %6995, %v5879_v57  }
 0xbd6   :  { %6975 = vmatprep.subr.bf16.mxu0 %v6974_v41 }
 0xbd7   :  { %6977 = vmatpush3.bf16.msra.mxu0 %v6974_v41 }
 0xbd8   :  { %6052 = vperm.xlu1 %6996, %v5878_v16   ;;  %v6362_v16 = vld [vmem:[%s8516_s7] ss:$0 sm:$0xff] }
 0xc2a   :  { %v5824_v1 = vpop.permute.xlu0 %5823 }
 0xc2b   :  { %v5864_v2 = vsel %vm5863_vm12, %v5855_v43, %v5824_v1 }
 0xc2c   :  { %6918 = vmatprep.mubr.msk.f32.mxu1 %vm196_vm1, %v5864_v2 }
 0xc2d   :  { %v5826_v5 = vpop.permute.xlu1 %5825 }
 0xc2e   :  { %v5865_v31 = vsel %vm5863_vm12, %v5856_v12, %v5826_v5  ;;  %v5828_v38 = vpop.permute.xlu0 %5827 }
 0xc2f   :  { %v5866_v53 = vsel %vm5863_vm12, %v5857_v6, %v5828_v38  ;;  %6919 = vmatmul.mubr.msk.f32.vlgmr.msra.gmra.mrb[70].mxu1 %vm196_vm1, %v5865_v31 }
 0xc30   :  { %6921 = vmatprep.mubr.msk.f32.mxu1 %vm196_vm1, %v5866_v53 }
 0xc32   :  { %v5830_v27 = vpop.permute.xlu1 %5829 }
 0xc33   :  { %v5867_v17 = vsel %vm5863_vm12, %v5858_v8, %v5830_v27  ;;  %v5832_v30 = vpop.permute.xlu0 %5831 }
 0xc34   :  { %v5868_v42 = vsel %vm5863_vm12, %v5859_v39, %v5832_v30  ;;  %6922 = vmatmul.mubr.msk.f32.gmra.mrb[72].mxu1 %vm196_vm1, %v5867_v17  ;;  %v6371_v30 = vld [vmem:[%s8518_s9] ss:$0 sm:$0xff] }
 0xc35   :  { %6924 = vmatprep.mubr.msk.f32.mxu1 %vm196_vm1, %v5868_v42 }
 0xc36   :  { %v5834_v3 = vpop.permute.xlu1 %5833 }
 0xc37   :  { %v5869_v61 = vsel %vm5863_vm12, %v5860_v58, %v5834_v3  ;;  %v5836_v40 = vpop.permute.xlu0 %5835 }
 0xc38   :  { %v5870_v60 = vsel %vm5863_vm12, %v5861_v23, %v5836_v40  ;;  %6925 = vmatmul.mubr.msk.f32.gmra.mrb[74].mxu1 %vm196_vm1, %v5869_v61 }
 0xc39   :  { %6927 = vmatprep.mubr.msk.f32.mxu1 %vm196_vm1, %v5870_v60 }
 0xc3a   :  { %v5838_v52 = vpop.permute.xlu1 %5837 }
 0xc3b   :  { %v5871_v24 = vsel %vm5863_vm12, %v5862_v19, %v5838_v52 }
 0xc3c   :  { %6928 = vmatmul.mubr.msk.f32.gmra.mrb[76].mxu1 %vm196_vm1, %v5871_v24 }
 0xc48   :  { %v8414_v57 = vpop.permute.xlu0 %6022 }
 0xc4b   :  { %v8419_v51 = vpop.permute.xlu1 %6027 }
 0xc4c   :  { %v8422_v25 = vpop.permute.xlu0 %6037 }
 0xc4f   :  { %v8425_v33 = vpop.permute.xlu1 %6032 }
 0xc50   :  { %v6048_v43 = vpop.permute.xlu0 %6047 }
 0xc53   :  { %v6043_v47 = vpop.permute.xlu1 %6042 }
 0xc54   :  { %v6058_v8 = vpop.permute.xlu0 %6057 }
 0xc57   :  { %v6053_v34 = vpop.permute.xlu1 %6052 }
 0xd02   :  { %v6920_v28 = vpop.f32.mrb[70].mxu1 }
 0xd03   :  { %v5987_v4 = vadd.f32 %v6920_v28, %v6362_v16  ;;  %v5981_v7 = vpop.f32.mrb[71].mxu1 }
 0xd04   :  { %v5982_v21 = vadd.f32 %v6362_v16, %v5981_v7 }
 0xd05   :  { %v6061_v11 = vmul.f32 %v8419_v51, %v5987_v4 }
 0xd06   :  { %v6060_v14 = vmul.f32 %v8414_v57, %v5982_v21 }
 0xd07   :  { %v6069_v22 = vmax.f32 %v6061_v11, 0.0  ;;  %v6923_v44 = vpop.f32.mrb[72].mxu1 }
 0xd08   :  { %v6068_v10 = vmax.f32 %v6060_v14, 0.0  ;;  %v5997_v46 = vadd.f32 %v6923_v44, %v6362_v16  ;;  %v5991_v29 = vpop.f32.mrb[73].mxu1 }
 0xd09   :  { %6225 = vst.msk [vmem:[%s8517_s11 + $0x8] sm:$0xff] %vm196_vm1, %v6069_v22  ;;  %v5992_v32 = vadd.f32 %v6362_v16, %v5991_v29 }
 0xd0a   :  { %6224 = vst.msk [vmem:[%s8517_s11] sm:$0xff] %vm196_vm1, %v6068_v10  ;;  %v6063_v0 = vmul.f32 %v8422_v25, %v5997_v46  ;;  %6938 = vmatprep.mubr.msk.f32.mxu0 %vm196_vm1, %v6068_v10 }
 0xd0b   :  { %v6062_v45 = vmul.f32 %v8425_v33, %v5992_v32  ;;  %v6926_v20 = vpop.f32.mrb[74].mxu1  ;;  %6939 = vmatmul.mubr.msk.f32.vlgmr.msra.gmra.mrb[74].mxu0 %vm196_vm1, %v6069_v22 }
 0xd0c   :  { %v6071_v1 = vmax.f32 %v6063_v0, 0.0  ;;  %v6007_v2 = vadd.f32 %v6926_v20, %v6362_v16  ;;  %v6001_v18 = vpop.f32.mrb[75].mxu1 }
 0xd0d   :  { %v6070_v12 = vmax.f32 %v6062_v45, 0.0  ;;  %v6002_v13 = vadd.f32 %v6362_v16, %v6001_v18 }
 0xd0e   :  { %6227 = vst.msk [vmem:[%s8517_s11 + $0x18] sm:$0xff] %vm196_vm1, %v6071_v1  ;;  %v6065_v48 = vmul.f32 %v6048_v43, %v6007_v2 }
 0xd0f   :  { %6226 = vst.msk [vmem:[%s8517_s11 + $0x10] sm:$0xff] %vm196_vm1, %v6070_v12  ;;  %v6064_v5 = vmul.f32 %v6043_v47, %v6002_v13  ;;  %v6929_v6 = vpop.f32.mrb[76].mxu1  ;;  %6941 = vmatprep.mubr.msk.f32.mxu0 %vm196_vm1, %v6070_v12 }
 0xd10   :  { %v6073_v31 = vmax.f32 %v6065_v48, 0.0  ;;  %v6017_v38 = vadd.f32 %v6929_v6, %v6362_v16  ;;  %v6011_v53 = vpop.f32.mrb[77].mxu1  ;;  %6942 = vmatmul.mubr.msk.f32.gmra.mrb[76].mxu0 %vm196_vm1, %v6071_v1 }
 0xd11   :  { %v6072_v37 = vmax.f32 %v6064_v5, 0.0  ;;  %v6012_v56 = vadd.f32 %v6362_v16, %v6011_v53 }
 0xd12   :  { %6229 = vst.msk [vmem:[%s8517_s11 + $0x28] sm:$0xff] %vm196_vm1, %v6073_v31  ;;  %v6067_v9 = vmul.f32 %v6058_v8, %v6017_v38 }
 0xd13   :  { %6228 = vst.msk [vmem:[%s8517_s11 + $0x20] sm:$0xff] %vm196_vm1, %v6072_v37  ;;  %v6066_v27 = vmul.f32 %v6053_v34, %v6012_v56  ;;  %6944 = vmatprep.mubr.msk.f32.mxu0 %vm196_vm1, %v6072_v37 }
 0xd14   :  { %v6075_v39 = vmax.f32 %v6067_v9, 0.0  ;;  %6945 = vmatmul.mubr.msk.f32.gmra.mrb[78].mxu0 %vm196_vm1, %v6073_v31 }
 0xd15   :  { %v6074_v17 = vmax.f32 %v6066_v27, 0.0 }
 0xd16   :  { %6231 = vst.msk [vmem:[%s8517_s11 + $0x38] sm:$0xff] %vm196_vm1, %v6075_v39 }
 0xd17   :  { %6230 = vst.msk [vmem:[%s8517_s11 + $0x30] sm:$0xff] %vm196_vm1, %v6074_v17  ;;  %6947 = vmatprep.mubr.msk.f32.mxu0 %vm196_vm1, %v6074_v17 }
 0xd18   :  { %6948 = vmatmul.mubr.msk.f32.gmra.mrb[80].mxu0 %vm196_vm1, %v6075_v39 }
 0xdde   :  { %v6940_v42 = vpop.f32.mrb[74].mxu0 }
 0xddf   :  { %v6183_v63 = vadd.f32 %v6940_v42, %v6371_v30  ;;  %v6177_v54 = vpop.f32.mrb[75].mxu0 }
 0xde0   :  { %v6178_v58 = vadd.f32 %v6371_v30, %v6177_v54 }
 0xde1   :  { %v6217_v26 = vmul.f32 %v6183_v63, %v8419_v51 }
 0xde2   :  { %v6216_v59 = vmul.f32 %v6178_v58, %v8414_v57 }
 0xde3   :  { %6234 = vst.msk [vmem:[%s8519_s10 + $0x8] sm:$0xff] %vm6232_vm13, %v6217_v26  ;;  %v6943_v3 = vpop.f32.mrb[76].mxu0 }
 0xde4   :  { %6233 = vst.msk [vmem:[%s8519_s10] sm:$0xff] %vm6232_vm13, %v6216_v59  ;;  %v6193_v23 = vadd.f32 %v6943_v3, %v6371_v30  ;;  %v6187_v61 = vpop.f32.mrb[77].mxu0 }
 0xde5   :  { %v6188_v40 = vadd.f32 %v6371_v30, %v6187_v61 }
 0xde6   :  { %v6219_v60 = vmul.f32 %v6193_v23, %v8422_v25 }
 0xde7   :  { %v6218_v15 = vmul.f32 %v6188_v40, %v8425_v33  ;;  %v6946_v36 = vpop.f32.mrb[78].mxu0 }
 0xde8   :  { %6236 = vst.msk [vmem:[%s8519_s10 + $0x18] sm:$0xff] %vm6232_vm13, %v6219_v60  ;;  %v6203_v19 = vadd.f32 %v6946_v36, %v6371_v30  ;;  %v6197_v52 = vpop.f32.mrb[79].mxu0 }
 0xde9   :  { %6235 = vst.msk [vmem:[%s8519_s10 + $0x10] sm:$0xff] %vm6232_vm13, %v6218_v15  ;;  %v6198_v24 = vadd.f32 %v6371_v30, %v6197_v52 }
 0xdea   :  { %v6221_v62 = vmul.f32 %v6203_v19, %v6048_v43 }
 0xdeb   :  { %v6220_v49 = vmul.f32 %v6198_v24, %v6043_v47  ;;  %v6949_v50 = vpop.f32.mrb[80].mxu0 }
 0xdec   :  { %6238 = vst.msk [vmem:[%s8519_s10 + $0x28] sm:$0xff] %vm6232_vm13, %v6221_v62  ;;  %v6213_v55 = vadd.f32 %v6949_v50, %v6371_v30  ;;  %v6207_v35 = vpop.f32.mrb[81].mxu0 }
 0xded   :  { %6237 = vst.msk [vmem:[%s8519_s10 + $0x20] sm:$0xff] %vm6232_vm13, %v6220_v49  ;;  %v6208_v41 = vadd.f32 %v6371_v30, %v6207_v35 }
 0xdee   :  { %v6223_v57 = vmul.f32 %v6213_v55, %v6058_v8 }
 0xdef   :  { %v6222_v16 = vmul.f32 %v6208_v41, %v6053_v34 }
 0xdf0   :  { %6240 = vst.msk [vmem:[%s8519_s10 + $0x38] sm:$0xff] %vm6232_vm13, %v6223_v57 }
 0xdf1   :  { %6239 = vst.msk [vmem:[%s8519_s10 + $0x30] sm:$0xff] %vm6232_vm13, %v6222_v16 }

</bundles_post_ra>
